<compile_context>
chip_gen: v7x
topology: tpu7x:2x2x1
jax: 0.10.0
libtpu: 0.0.40
codegen_flags: <defaults>
</compile_context>

<pallas_src>
import jax
import jax.numpy as jnp
from jax import lax
from jax.experimental import pallas as pl
from jax.experimental.pallas import tpu as pltpu


def matchattn_kernel(x_ref, y_ref, bias_ref, wxt_ref, bx_ref, wyt_ref, by_ref,
                     wt_ref, matched_ref, alpha_ref, ywt_ref):
    # Grid = (batch, l1_tile); l1 is the inner, sequential ("arbitrary") axis.
    l_idx = pl.program_id(1)

    # ---- per-batch precompute (first L1 tile only) ----
    # yW^T = W^T @ y_proj^T, stored transposed (Hp, L2p) so every per-tile score
    # GEMM below is a plain (TL1, Hp) @ (Hp, L2p) matmul (no per-tile transposes).
    @pl.when(l_idx == 0)
    def _():
        y = y_ref[0]                                              # (L2p, D2) bf16
        y_proj = jnp.maximum(
            jnp.dot(y, wyt_ref[...], preferred_element_type=jnp.float32)
            + by_ref[...], 0.0)                                   # (L2p, Hp) f32
        ywt = lax.dot_general(                                    # (Hp, L2p) f32
            wt_ref[...], y_proj.astype(jnp.bfloat16),
            (((1,), (1,)), ((), ())),
            preferred_element_type=jnp.float32)
        ywt_ref[...] = ywt.astype(jnp.bfloat16)

    # ---- x projection for this L1 tile ----
    x = x_ref[0]                                                  # (TL1, D1) bf16
    x_proj = jnp.maximum(
        jnp.dot(x, wxt_ref[...], preferred_element_type=jnp.float32)
        + bx_ref[...], 0.0)                                       # (TL1, Hp) f32

    # scores = x_proj @ yW^T   (plain matmul against the transposed scratch)
    scores = jnp.dot(x_proj.astype(jnp.bfloat16), ywt_ref[...],
                     preferred_element_type=jnp.float32)          # (TL1, L2p) f32

    # additive padding mask (0 for real columns, -1e30 for padded/masked columns)
    scores = scores + bias_ref[0]

    # masked softmax over L2 (f32 math; v5e-safe)
    m = jnp.max(scores, axis=-1, keepdims=True)
    p = jnp.exp(scores - m)
    denom = jnp.sum(p, axis=-1, keepdims=True)
    alpha = p * pl.reciprocal(denom, approx=True)                 # (TL1, L2p)

    # matched_seq = alpha @ y
    matched = jnp.dot(alpha.astype(jnp.bfloat16), y_ref[0],
                      preferred_element_type=jnp.float32)         # (TL1, D2)

    matched_ref[0] = matched.astype(matched_ref.dtype)
    alpha_ref[0] = alpha.astype(alpha_ref.dtype)                  # bf16 writeback


def _round_up(v, m):
    return -(-v // m) * m


def _vmem_capacity_bytes():
    try:
        return int(pltpu.get_tpu_info().vmem_capacity_bytes)
    except Exception:
        return 64 * 1024 * 1024   # conservative: v7x per-TensorCore VMEM


def _pick_l1_tile(L1, L2p, D1, D2, Hp, budget):
    """Largest MXU-friendly L1 tile whose per-step VMEM footprint fits budget."""
    fixed = (L2p * D2 * 2                 # y (bf16, single-buffered)
             + L2p * 4                    # mask bias (f32)
             + Hp * L2p * 2               # yW^T scratch (bf16)
             + (D1 + D2 + Hp) * Hp * 2    # Wx^T, Wy^T, W^T (bf16)
             + 2 * Hp * 4)                # bx, by (f32)

    def per_tile(t):
        return (2 * t * D1 * 2            # x tile (bf16, double-buffered)
                + 2 * t * D2 * 4          # matched out (f32, double-buffered)
                + 2 * t * L2p * 2         # alpha out (bf16, double-buffered)
                + 3 * t * L2p * 4         # f32 scores / exp temporaries
                + 2 * t * Hp * 4)         # x_proj f32 (+ bf16 copy)

    tile = 128
    for t in (512, 256, 128):
        if fixed + per_tile(t) <= budget:
            tile = t
            break
    if L1 <= tile:                         # small L1: one sublane-padded tile
        tile = max(8, _round_up(L1, 8))
    return tile, fixed + per_tile(tile)


def match_attn(x, y, y_mask, params):
    """Pallas wrapper.

    x: (B, L1, D1) f32, y: (B, L2, D2) f32, y_mask: (B, L2) f32 (1 = padding).
    Returns (matched_seq (B, L1, D2) f32, alpha (B, L1, L2) f32).
    """
    B, L1, D1 = x.shape
    _, L2, D2 = y.shape
    wx, bx, wy, by, w = params
    H = wx.shape[0]

    # ---- wrapper-side layout plumbing (one-time, outside the kernel) ----
    Hp = _round_up(H, 128)                # MXU-native contraction width
    L2p = _round_up(L2, 128)              # lane-dense scores / alpha width
    pad2 = L2p - L2
    padH = Hp - H

    y_p = jnp.pad(y, ((0, 0), (0, pad2), (0, 0))) if pad2 else y
    mask_p = y_mask.astype(jnp.float32)
    if pad2:
        mask_p = jnp.pad(mask_p, ((0, 0), (0, pad2)), constant_values=1.0)
    bias = jnp.where(mask_p > 0.5, jnp.float32(-1e30),
                     jnp.float32(0.0)).reshape(B, 1, L2p)

    # bf16 MXU operands, H zero-padded (relu(0) = 0 => math unchanged)
    x_bf = x.astype(jnp.bfloat16)
    y_bf = y_p.astype(jnp.bfloat16)
    wx_t = jnp.pad(wx.T, ((0, 0), (0, padH))).astype(jnp.bfloat16)     # (D1, Hp)
    wy_t = jnp.pad(wy.T, ((0, 0), (0, padH))).astype(jnp.bfloat16)     # (D2, Hp)
    w_t = jnp.pad(w.T, ((0, padH), (0, padH))).astype(jnp.bfloat16)    # (Hp, Hp)
    bx2 = jnp.pad(bx, (0, padH)).reshape(1, Hp).astype(jnp.float32)
    by2 = jnp.pad(by, (0, padH)).reshape(1, Hp).astype(jnp.float32)

    # ---- VMEM-budget-aware L1 tiling + explicit vmem limit with headroom ----
    vmem_cap = _vmem_capacity_bytes()
    TL1, vmem_est = _pick_l1_tile(L1, L2p, D1, D2, Hp, int(0.8 * vmem_cap))
    L1p = _round_up(L1, TL1)
    pad1 = L1p - L1
    nL1 = L1p // TL1
    if pad1:
        x_bf = jnp.pad(x_bf, ((0, 0), (0, pad1), (0, 0)))
    vmem_limit = int(min(vmem_cap, max(int(vmem_est * 1.5), 32 * 1024 * 1024)))

    cost = pl.CostEstimate(
        flops=2 * B * (L1p * D1 * Hp + L2p * D2 * Hp + Hp * Hp * L2p
                       + L1p * Hp * L2p + L1p * L2p * D2),
        transcendentals=B * L1p * L2p,
        bytes_accessed=(x_bf.size * 2 + y_bf.size * 2 + bias.size * 4
                        + (wx_t.size + wy_t.size + w_t.size) * 2
                        + (bx2.size + by2.size) * 4
                        + B * L1p * D2 * 4 + B * L1p * L2p * 2))

    def build(single_buffer_consts):
        if single_buffer_consts:
            # Constant-index / per-batch blocks: no second (never-used) buffer.
            def const(shape, imap):
                return pl.BlockSpec(shape, imap, pipeline_mode=pl.Buffered(1))
        else:
            const = pl.BlockSpec
        grid_spec = pltpu.PrefetchScalarGridSpec(
            num_scalar_prefetch=0,
            grid=(B, nL1),
            in_specs=[
                pl.BlockSpec((1, TL1, D1), lambda b, l: (b, l, 0)),   # x tile
                const((1, L2p, D2), lambda b, l: (b, 0, 0)),          # y (per batch)
                const((1, 1, L2p), lambda b, l: (b, 0, 0)),           # mask bias
                const((D1, Hp), lambda b, l: (0, 0)),                 # Wx^T
                const((1, Hp), lambda b, l: (0, 0)),                  # bx
                const((D2, Hp), lambda b, l: (0, 0)),                 # Wy^T
                const((1, Hp), lambda b, l: (0, 0)),                  # by
                const((Hp, Hp), lambda b, l: (0, 0)),                 # W^T (no bias)
            ],
            out_specs=[
                pl.BlockSpec((1, TL1, D2), lambda b, l: (b, l, 0)),   # matched_seq
                pl.BlockSpec((1, TL1, L2p), lambda b, l: (b, l, 0)),  # alpha (bf16)
            ],
            scratch_shapes=[
                pltpu.VMEM((Hp, L2p), jnp.bfloat16),                  # yW^T, per batch
            ],
        )
        return pl.pallas_call(
            matchattn_kernel,
            out_shape=(
                jax.ShapeDtypeStruct((B, L1p, D2), jnp.float32),
                jax.ShapeDtypeStruct((B, L1p, L2p), jnp.bfloat16),
            ),
            grid_spec=grid_spec,
            compiler_params=pltpu.CompilerParams(
                # L1 axis carries the per-batch yW^T scratch -> keep it sequential.
                dimension_semantics=("parallel", "arbitrary"),
                vmem_limit_bytes=vmem_limit),
            cost_estimate=cost,
        )

    args = (x_bf, y_bf, bias, wx_t, bx2, wy_t, by2, w_t)
    try:
        matched, alpha_full = build(True)(*args)
    except Exception:
        # Fallback for JAX builds without per-operand pipeline_mode support.
        matched, alpha_full = build(False)(*args)

    if pad1:
        matched = matched[:, :L1, :]
    alpha = alpha_full
    if pad1 or pad2:
        alpha = alpha[:, :L1, :L2]
    return matched, alpha.astype(jnp.float32)


def match_attn_ref(x, y, y_mask, params):
    """Pure-JAX f32 reference mirroring the PyTorch forward."""
    wx, bx, wy, by, w = params
    x_proj = jax.nn.relu(jnp.einsum('bld,hd->blh', x, wx) + bx)
    y_proj = jax.nn.relu(jnp.einsum('bld,hd->blh', y, wy) + by)
    xw = jnp.einsum('blh,gh->blg', x_proj, w)
    scores = jnp.einsum('blh,bmh->blm', xw, y_proj)
    scores = jnp.where(y_mask[:, None, :] > 0.5, -jnp.inf, scores)
    alpha = jax.nn.softmax(scores, axis=-1)
    matched = jnp.einsum('blm,bmd->bld', alpha, y)
    return matched, alpha


if __name__ == "__main__":
    B, L1, L2, D = 2, 8, 8, 32   # input_size1 == input_size2 == D, hidden = D
    H = D

    key = jax.random.PRNGKey(0)
    kx, ky, kwx, kbx, kwy, kby, kw = jax.random.split(key, 7)

    x = jax.random.normal(kx, (B, L1, D), dtype=jnp.float32)
    y = jax.random.normal(ky, (B, L2, D), dtype=jnp.float32)
    # deterministic padding mask: last 2 positions of y are padding
    y_mask = jnp.zeros((B, L2), dtype=jnp.float32).at[:, -2:].set(1.0)

    scale = 1.0 / jnp.sqrt(jnp.float32(D))
    params = (
        (jax.random.uniform(kwx, (H, D), minval=-1.0, maxval=1.0) * scale).astype(jnp.float32),
        (jax.random.uniform(kbx, (H,), minval=-1.0, maxval=1.0) * scale).astype(jnp.float32),
        (jax.random.uniform(kwy, (H, D), minval=-1.0, maxval=1.0) * scale).astype(jnp.float32),
        (jax.random.uniform(kby, (H,), minval=-1.0, maxval=1.0) * scale).astype(jnp.float32),
        (jax.random.uniform(kw, (H, H), minval=-1.0, maxval=1.0) * scale).astype(jnp.float32),
    )

    matched, alpha = match_attn(x, y, y_mask, params)
    jax.block_until_ready((matched, alpha))

    matched_ref, alpha_ref = match_attn_ref(x, y, y_mask, params)
    # bf16 MXU operands + bf16 alpha writeback + approx reciprocal -> bf16-level tolerances.
    assert jnp.allclose(matched, matched_ref, atol=5e-2, rtol=5e-2)
    assert jnp.allclose(alpha, alpha_ref, atol=5e-2, rtol=5e-2)
    assert jnp.allclose(jnp.sum(alpha, axis=-1), 1.0, atol=1e-2)
    assert float(jnp.max(jnp.abs(alpha[:, :, -2:]))) < 1e-12  # padded positions -> zero weight
    assert matched.shape == (B, L1, D) and alpha.shape == (B, L1, L2)

    print("KERNEL_OK")
</pallas_src>

<mosaic_0001>
module attributes {stable_mosaic.version = 11 : i64} {
  func.func @matchattn_kernel(%arg0: i32, %arg1: i32, %arg2: memref<1x8x32xbf16, #tpu.memory_space<vmem>>, %arg3: memref<1x128x32xbf16, #tpu.memory_space<vmem>>, %arg4: memref<1x1x128xf32, #tpu.memory_space<vmem>>, %arg5: memref<32x128xbf16, #tpu.memory_space<vmem>>, %arg6: memref<1x128xf32, #tpu.memory_space<vmem>>, %arg7: memref<32x128xbf16, #tpu.memory_space<vmem>>, %arg8: memref<1x128xf32, #tpu.memory_space<vmem>>, %arg9: memref<128x128xbf16, #tpu.memory_space<vmem>>, %arg10: memref<1x8x32xf32, #tpu.memory_space<vmem>>, %arg11: memref<1x8x128xbf16, #tpu.memory_space<vmem>>, %arg12: memref<128x128xbf16, #tpu.memory_space<vmem>>) attributes {dimension_semantics = [#tpu.dimension_semantics<parallel>, #tpu.dimension_semantics<arbitrary>], iteration_bounds = array<i64: 2, 1>, scalar_prefetch = 0 : i64, scratch_operands = 1 : i64, tpu.core_type = #tpu.core_type<tc>, window_params = [{transform_indices = @transform_0, window_bounds = array<i64: 1, 8, 32>}, {pipeline_mode = #tpu.pipeline_mode<synchronous>, transform_indices = @transform_1, window_bounds = array<i64: 1, 128, 32>}, {pipeline_mode = #tpu.pipeline_mode<synchronous>, transform_indices = @transform_2, window_bounds = array<i64: 1, 1, 128>}, {pipeline_mode = #tpu.pipeline_mode<synchronous>, transform_indices = @transform_3, window_bounds = array<i64: 32, 128>}, {pipeline_mode = #tpu.pipeline_mode<synchronous>, transform_indices = @transform_4, window_bounds = array<i64: 1, 128>}, {pipeline_mode = #tpu.pipeline_mode<synchronous>, transform_indices = @transform_5, window_bounds = array<i64: 32, 128>}, {pipeline_mode = #tpu.pipeline_mode<synchronous>, transform_indices = @transform_6, window_bounds = array<i64: 1, 128>}, {pipeline_mode = #tpu.pipeline_mode<synchronous>, transform_indices = @transform_7, window_bounds = array<i64: 128, 128>}, {transform_indices = @transform_8, window_bounds = array<i64: 1, 8, 32>}, {transform_indices = @transform_9, window_bounds = array<i64: 1, 8, 128>}]} {
    %c0_i32 = arith.constant 0 : i32
    %0 = arith.cmpi eq, %arg1, %c0_i32 : i32
    %1 = arith.extui %0 : i1 to i32
    %c0_i32_0 = arith.constant 0 : i32
    %2 = arith.cmpi ne, %1, %c0_i32_0 : i32
    scf.if %2 {
      %c0_26 = arith.constant 0 : index
      %c0_27 = arith.constant 0 : index
      %c0_28 = arith.constant 0 : index
      %40 = vector.load %arg3[%c0_26, %c0_27, %c0_28] : memref<1x128x32xbf16, #tpu.memory_space<vmem>>, vector<1x128x32xbf16>
      %41 = vector.shape_cast %40 : vector<1x128x32xbf16> to vector<128x32xbf16>
      %c0_29 = arith.constant 0 : index
      %c0_30 = arith.constant 0 : index
      %42 = vector.load %arg7[%c0_29, %c0_30] : memref<32x128xbf16, #tpu.memory_space<vmem>>, vector<32x128xbf16>
      %cst_31 = arith.constant dense<0.000000e+00> : vector<128x128xf32>
      %43 = tpu.matmul %41, %42, %cst_31 {dimension_numbers = #tpu.dot_dimension_numbers<[1], [0], [0], [1], [0, 0, 1, 1], [], []>} : vector<128x32xbf16>, vector<32x128xbf16>, vector<128x128xf32> -> vector<128x128xf32>
      %c0_32 = arith.constant 0 : index
      %c0_33 = arith.constant 0 : index
      %44 = vector.load %arg8[%c0_32, %c0_33] : memref<1x128xf32, #tpu.memory_space<vmem>>, vector<1x128xf32>
      %45 = vector.broadcast %44 : vector<1x128xf32> to vector<128x128xf32>
      %46 = arith.addf %43, %45 : vector<128x128xf32>
      %cst_34 = arith.constant 0.000000e+00 : f32
      %47 = vector.broadcast %cst_34 : f32 to vector<128x128xf32>
      %48 = arith.maximumf %46, %47 : vector<128x128xf32>
      %c0_35 = arith.constant 0 : index
      %c0_36 = arith.constant 0 : index
      %49 = vector.load %arg9[%c0_35, %c0_36] : memref<128x128xbf16, #tpu.memory_space<vmem>>, vector<128x128xbf16>
      %50 = arith.truncf %48 : vector<128x128xf32> to vector<128x128xbf16>
      %cst_37 = arith.constant dense<0.000000e+00> : vector<128x128xf32>
      %51 = tpu.matmul %49, %50, %cst_37 {dimension_numbers = #tpu.dot_dimension_numbers<[1], [1], [0], [0], [0, 0, 1, 0], [], []>} : vector<128x128xbf16>, vector<128x128xbf16>, vector<128x128xf32> -> vector<128x128xf32>
      %52 = arith.truncf %51 : vector<128x128xf32> to vector<128x128xbf16>
      %c0_38 = arith.constant 0 : index
      %c0_39 = arith.constant 0 : index
      %53 = vector.load %arg12[%c0_38, %c0_39] : memref<128x128xbf16, #tpu.memory_space<vmem>>, vector<128x128xbf16>
      tpu.vector_store %arg12[%c0_38, %c0_39], %52 {strides = array<i32>} : memref<128x128xbf16, #tpu.memory_space<vmem>>, vector<128x128xbf16>,
    } else {
    }
    %c0 = arith.constant 0 : index
    %c0_1 = arith.constant 0 : index
    %c0_2 = arith.constant 0 : index
    %3 = vector.load %arg2[%c0, %c0_1, %c0_2] : memref<1x8x32xbf16, #tpu.memory_space<vmem>>, vector<1x8x32xbf16>
    %4 = vector.shape_cast %3 : vector<1x8x32xbf16> to vector<8x32xbf16>
    %c0_3 = arith.constant 0 : index
    %c0_4 = arith.constant 0 : index
    %5 = vector.load %arg5[%c0_3, %c0_4] : memref<32x128xbf16, #tpu.memory_space<vmem>>, vector<32x128xbf16>
    %cst = arith.constant dense<0.000000e+00> : vector<8x128xf32>
    %6 = tpu.matmul %4, %5, %cst {dimension_numbers = #tpu.dot_dimension_numbers<[1], [0], [0], [1], [0, 0, 1, 1], [], []>} : vector<8x32xbf16>, vector<32x128xbf16>, vector<8x128xf32> -> vector<8x128xf32>
    %c0_5 = arith.constant 0 : index
    %c0_6 = arith.constant 0 : index
    %7 = vector.load %arg6[%c0_5, %c0_6] : memref<1x128xf32, #tpu.memory_space<vmem>>, vector<1x128xf32>
    %8 = vector.broadcast %7 : vector<1x128xf32> to vector<8x128xf32>
    %9 = arith.addf %6, %8 : vector<8x128xf32>
    %cst_7 = arith.constant 0.000000e+00 : f32
    %10 = vector.broadcast %cst_7 : f32 to vector<8x128xf32>
    %11 = arith.maximumf %9, %10 : vector<8x128xf32>
    %12 = arith.truncf %11 : vector<8x128xf32> to vector<8x128xbf16>
    %c0_8 = arith.constant 0 : index
    %c0_9 = arith.constant 0 : index
    %13 = vector.load %arg12[%c0_8, %c0_9] : memref<128x128xbf16, #tpu.memory_space<vmem>>, vector<128x128xbf16>
    %cst_10 = arith.constant dense<0.000000e+00> : vector<8x128xf32>
    %14 = tpu.matmul %12, %13, %cst_10 {dimension_numbers = #tpu.dot_dimension_numbers<[1], [0], [0], [1], [0, 0, 1, 1], [], []>} : vector<8x128xbf16>, vector<128x128xbf16>, vector<8x128xf32> -> vector<8x128xf32>
    %c0_11 = arith.constant 0 : index
    %c0_12 = arith.constant 0 : index
    %c0_13 = arith.constant 0 : index
    %15 = vector.load %arg4[%c0_11, %c0_12, %c0_13] : memref<1x1x128xf32, #tpu.memory_space<vmem>>, vector<1x1x128xf32>
    %16 = vector.shape_cast %15 : vector<1x1x128xf32> to vector<1x128xf32>
    %17 = vector.broadcast %16 : vector<1x128xf32> to vector<8x128xf32>
    %18 = arith.addf %14, %17 : vector<8x128xf32>
    %cst_14 = arith.constant dense<0xFF800000> : vector<8xf32>
    %19 = vector.multi_reduction <maximumf>, %18, %cst_14 [1] : vector<8x128xf32> to vector<8xf32>
    %20 = vector.shape_cast %19 : vector<8xf32> to vector<8x1xf32>
    %21 = vector.broadcast %20 : vector<8x1xf32> to vector<8x128xf32>
    %22 = arith.subf %18, %21 : vector<8x128xf32>
    %23 = math.exp %22 : vector<8x128xf32>
    %cst_15 = arith.constant dense<0.000000e+00> : vector<8xf32>
    %24 = vector.multi_reduction <add>, %23, %cst_15 [1] : vector<8x128xf32> to vector<8xf32>
    %25 = vector.shape_cast %24 : vector<8xf32> to vector<8x1xf32>
    %26 = tpu.reciprocal %25 {approx = true} : vector<8x1xf32> -> vector<8x1xf32>
    %27 = vector.broadcast %26 : vector<8x1xf32> to vector<8x128xf32>
    %28 = arith.mulf %23, %27 : vector<8x128xf32>
    %29 = arith.truncf %28 : vector<8x128xf32> to vector<8x128xbf16>
    %c0_16 = arith.constant 0 : index
    %c0_17 = arith.constant 0 : index
    %c0_18 = arith.constant 0 : index
    %30 = vector.load %arg3[%c0_16, %c0_17, %c0_18] : memref<1x128x32xbf16, #tpu.memory_space<vmem>>, vector<1x128x32xbf16>
    %31 = vector.shape_cast %30 : vector<1x128x32xbf16> to vector<128x32xbf16>
    %cst_19 = arith.constant dense<0.000000e+00> : vector<8x32xf32>
    %32 = tpu.matmul %29, %31, %cst_19 {dimension_numbers = #tpu.dot_dimension_numbers<[1], [0], [0], [1], [0, 0, 1, 1], [], []>} : vector<8x128xbf16>, vector<128x32xbf16>, vector<8x32xf32> -> vector<8x32xf32>
    %c0_20 = arith.constant 0 : index
    %c0_21 = arith.constant 0 : index
    %c0_22 = arith.constant 0 : index
    %33 = vector.load %arg10[%c0_20, %c0_21, %c0_22] : memref<1x8x32xf32, #tpu.memory_space<vmem>>, vector<1x8x32xf32>
    %34 = vector.shape_cast %33 : vector<1x8x32xf32> to vector<8x32xf32>
    %35 = vector.shape_cast %32 : vector<8x32xf32> to vector<1x8x32xf32>
    tpu.vector_store %arg10[%c0_20, %c0_21, %c0_22], %35 {strides = array<i32>} : memref<1x8x32xf32, #tpu.memory_space<vmem>>, vector<1x8x32xf32>,
    %36 = arith.truncf %28 : vector<8x128xf32> to vector<8x128xbf16>
    %c0_23 = arith.constant 0 : index
    %c0_24 = arith.constant 0 : index
    %c0_25 = arith.constant 0 : index
    %37 = vector.load %arg11[%c0_23, %c0_24, %c0_25] : memref<1x8x128xbf16, #tpu.memory_space<vmem>>, vector<1x8x128xbf16>
    %38 = vector.shape_cast %37 : vector<1x8x128xbf16> to vector<8x128xbf16>
    %39 = vector.shape_cast %36 : vector<8x128xbf16> to vector<1x8x128xbf16>
    tpu.vector_store %arg11[%c0_23, %c0_24, %c0_25], %39 {strides = array<i32>} : memref<1x8x128xbf16, #tpu.memory_space<vmem>>, vector<1x8x128xbf16>,
    return
  }
  func.func @transform_0(%arg0: i32, %arg1: i32) -> (i32, i32, i32) {
    %c0_i32 = arith.constant 0 : i32
    %c0_i32_0 = arith.constant 0 : i32
    return %arg0, %arg1, %c0_i32 : i32, i32, i32
  }
  func.func @transform_1(%arg0: i32, %arg1: i32) -> (i32, i32, i32) {
    %c0_i32 = arith.constant 0 : i32
    %c0_i32_0 = arith.constant 0 : i32
    %c0_i32_1 = arith.constant 0 : i32
    return %arg0, %c0_i32, %c0_i32_0 : i32, i32, i32
  }
  func.func @transform_2(%arg0: i32, %arg1: i32) -> (i32, i32, i32) {
    %c0_i32 = arith.constant 0 : i32
    %c0_i32_0 = arith.constant 0 : i32
    %c0_i32_1 = arith.constant 0 : i32
    return %arg0, %c0_i32, %c0_i32_0 : i32, i32, i32
  }
  func.func @transform_3(%arg0: i32, %arg1: i32) -> (i32, i32) {
    %c0_i32 = arith.constant 0 : i32
    %c0_i32_0 = arith.constant 0 : i32
    %c0_i32_1 = arith.constant 0 : i32
    return %c0_i32, %c0_i32_0 : i32, i32
  }
  func.func @transform_4(%arg0: i32, %arg1: i32) -> (i32, i32) {
    %c0_i32 = arith.constant 0 : i32
    %c0_i32_0 = arith.constant 0 : i32
    %c0_i32_1 = arith.constant 0 : i32
    return %c0_i32, %c0_i32_0 : i32, i32
  }
  func.func @transform_5(%arg0: i32, %arg1: i32) -> (i32, i32) {
    %c0_i32 = arith.constant 0 : i32
    %c0_i32_0 = arith.constant 0 : i32
    %c0_i32_1 = arith.constant 0 : i32
    return %c0_i32, %c0_i32_0 : i32, i32
  }
  func.func @transform_6(%arg0: i32, %arg1: i32) -> (i32, i32) {
    %c0_i32 = arith.constant 0 : i32
    %c0_i32_0 = arith.constant 0 : i32
    %c0_i32_1 = arith.constant 0 : i32
    return %c0_i32, %c0_i32_0 : i32, i32
  }
  func.func @transform_7(%arg0: i32, %arg1: i32) -> (i32, i32) {
    %c0_i32 = arith.constant 0 : i32
    %c0_i32_0 = arith.constant 0 : i32
    %c0_i32_1 = arith.constant 0 : i32
    return %c0_i32, %c0_i32_0 : i32, i32
  }
  func.func @transform_8(%arg0: i32, %arg1: i32) -> (i32, i32, i32) {
    %c0_i32 = arith.constant 0 : i32
    %c0_i32_0 = arith.constant 0 : i32
    return %arg0, %arg1, %c0_i32 : i32, i32, i32
  }
  func.func @transform_9(%arg0: i32, %arg1: i32) -> (i32, i32, i32) {
    %c0_i32 = arith.constant 0 : i32
    %c0_i32_0 = arith.constant 0 : i32
    return %arg0, %arg1, %c0_i32 : i32, i32, i32
  }
}

module attributes {stable_mosaic.version = 11 : i64} {
  func.func @matchattn_kernel(%arg0: i32, %arg1: i32, %arg2: memref<1x8x32xbf16, #tpu.memory_space<vmem>>, %arg3: memref<1x128x32xbf16, #tpu.memory_space<vmem>>, %arg4: memref<1x1x128xf32, #tpu.memory_space<vmem>>, %arg5: memref<32x128xbf16, #tpu.memory_space<vmem>>, %arg6: memref<1x128xf32, #tpu.memory_space<vmem>>, %arg7: memref<32x128xbf16, #tpu.memory_space<vmem>>, %arg8: memref<1x128xf32, #tpu.memory_space<vmem>>, %arg9: memref<128x128xbf16, #tpu.memory_space<vmem>>, %arg10: memref<1x8x32xf32, #tpu.memory_space<vmem>>, %arg11: memref<1x8x128xbf16, #tpu.memory_space<vmem>>, %arg12: memref<128x128xbf16, #tpu.memory_space<vmem>>) attributes {dimension_semantics = [#tpu.dimension_semantics<parallel>, #tpu.dimension_semantics<arbitrary>], iteration_bounds = array<i64: 2, 1>, scalar_prefetch = 0 : i64, scratch_operands = 1 : i64, tpu.core_type = #tpu.core_type<tc>, window_params = [{transform_indices = @transform_0, window_bounds = array<i64: 1, 8, 32>}, {transform_indices = @transform_1, window_bounds = array<i64: 1, 128, 32>}, {transform_indices = @transform_2, window_bounds = array<i64: 1, 1, 128>}, {pipeline_mode = #tpu.pipeline_mode<synchronous>, transform_indices = @transform_3, window_bounds = array<i64: 32, 128>}, {pipeline_mode = #tpu.pipeline_mode<synchronous>, transform_indices = @transform_4, window_bounds = array<i64: 1, 128>}, {pipeline_mode = #tpu.pipeline_mode<synchronous>, transform_indices = @transform_5, window_bounds = array<i64: 32, 128>}, {pipeline_mode = #tpu.pipeline_mode<synchronous>, transform_indices = @transform_6, window_bounds = array<i64: 1, 128>}, {pipeline_mode = #tpu.pipeline_mode<synchronous>, transform_indices = @transform_7, window_bounds = array<i64: 128, 128>}, {transform_indices = @transform_8, window_bounds = array<i64: 1, 8, 32>}, {transform_indices = @transform_9, window_bounds = array<i64: 1, 8, 128>}]} {
    %c0_i32 = arith.constant 0 : i32
    %0 = arith.cmpi eq, %arg1, %c0_i32 : i32
    %1 = arith.extui %0 : i1 to i32
    %c0_i32_0 = arith.constant 0 : i32
    %2 = arith.cmpi ne, %1, %c0_i32_0 : i32
    scf.if %2 {
      %c0_26 = arith.constant 0 : index
      %c0_27 = arith.constant 0 : index
      %c0_28 = arith.constant 0 : index
      %40 = vector.load %arg3[%c0_26, %c0_27, %c0_28] : memref<1x128x32xbf16, #tpu.memory_space<vmem>>, vector<1x128x32xbf16>
      %41 = vector.shape_cast %40 : vector<1x128x32xbf16> to vector<128x32xbf16>
      %c0_29 = arith.constant 0 : index
      %c0_30 = arith.constant 0 : index
      %42 = vector.load %arg7[%c0_29, %c0_30] : memref<32x128xbf16, #tpu.memory_space<vmem>>, vector<32x128xbf16>
      %cst_31 = arith.constant dense<0.000000e+00> : vector<128x128xf32>
      %43 = tpu.matmul %41, %42, %cst_31 {dimension_numbers = #tpu.dot_dimension_numbers<[1], [0], [0], [1], [0, 0, 1, 1], [], []>} : vector<128x32xbf16>, vector<32x128xbf16>, vector<128x128xf32> -> vector<128x128xf32>
      %c0_32 = arith.constant 0 : index
      %c0_33 = arith.constant 0 : index
      %44 = vector.load %arg8[%c0_32, %c0_33] : memref<1x128xf32, #tpu.memory_space<vmem>>, vector<1x128xf32>
      %45 = vector.broadcast %44 : vector<1x128xf32> to vector<128x128xf32>
      %46 = arith.addf %43, %45 : vector<128x128xf32>
      %cst_34 = arith.constant 0.000000e+00 : f32
      %47 = vector.broadcast %cst_34 : f32 to vector<128x128xf32>
      %48 = arith.maximumf %46, %47 : vector<128x128xf32>
      %c0_35 = arith.constant 0 : index
      %c0_36 = arith.constant 0 : index
      %49 = vector.load %arg9[%c0_35, %c0_36] : memref<128x128xbf16, #tpu.memory_space<vmem>>, vector<128x128xbf16>
      %50 = arith.truncf %48 : vector<128x128xf32> to vector<128x128xbf16>
      %cst_37 = arith.constant dense<0.000000e+00> : vector<128x128xf32>
      %51 = tpu.matmul %49, %50, %cst_37 {dimension_numbers = #tpu.dot_dimension_numbers<[1], [1], [0], [0], [0, 0, 1, 0], [], []>} : vector<128x128xbf16>, vector<128x128xbf16>, vector<128x128xf32> -> vector<128x128xf32>
      %52 = arith.truncf %51 : vector<128x128xf32> to vector<128x128xbf16>
      %c0_38 = arith.constant 0 : index
      %c0_39 = arith.constant 0 : index
      %53 = vector.load %arg12[%c0_38, %c0_39] : memref<128x128xbf16, #tpu.memory_space<vmem>>, vector<128x128xbf16>
      tpu.vector_store %arg12[%c0_38, %c0_39], %52 {strides = array<i32>} : memref<128x128xbf16, #tpu.memory_space<vmem>>, vector<128x128xbf16>,
    } else {
    }
    %c0 = arith.constant 0 : index
    %c0_1 = arith.constant 0 : index
    %c0_2 = arith.constant 0 : index
    %3 = vector.load %arg2[%c0, %c0_1, %c0_2] : memref<1x8x32xbf16, #tpu.memory_space<vmem>>, vector<1x8x32xbf16>
    %4 = vector.shape_cast %3 : vector<1x8x32xbf16> to vector<8x32xbf16>
    %c0_3 = arith.constant 0 : index
    %c0_4 = arith.constant 0 : index
    %5 = vector.load %arg5[%c0_3, %c0_4] : memref<32x128xbf16, #tpu.memory_space<vmem>>, vector<32x128xbf16>
    %cst = arith.constant dense<0.000000e+00> : vector<8x128xf32>
    %6 = tpu.matmul %4, %5, %cst {dimension_numbers = #tpu.dot_dimension_numbers<[1], [0], [0], [1], [0, 0, 1, 1], [], []>} : vector<8x32xbf16>, vector<32x128xbf16>, vector<8x128xf32> -> vector<8x128xf32>
    %c0_5 = arith.constant 0 : index
    %c0_6 = arith.constant 0 : index
    %7 = vector.load %arg6[%c0_5, %c0_6] : memref<1x128xf32, #tpu.memory_space<vmem>>, vector<1x128xf32>
    %8 = vector.broadcast %7 : vector<1x128xf32> to vector<8x128xf32>
    %9 = arith.addf %6, %8 : vector<8x128xf32>
    %cst_7 = arith.constant 0.000000e+00 : f32
    %10 = vector.broadcast %cst_7 : f32 to vector<8x128xf32>
    %11 = arith.maximumf %9, %10 : vector<8x128xf32>
    %12 = arith.truncf %11 : vector<8x128xf32> to vector<8x128xbf16>
    %c0_8 = arith.constant 0 : index
    %c0_9 = arith.constant 0 : index
    %13 = vector.load %arg12[%c0_8, %c0_9] : memref<128x128xbf16, #tpu.memory_space<vmem>>, vector<128x128xbf16>
    %cst_10 = arith.constant dense<0.000000e+00> : vector<8x128xf32>
    %14 = tpu.matmul %12, %13, %cst_10 {dimension_numbers = #tpu.dot_dimension_numbers<[1], [0], [0], [1], [0, 0, 1, 1], [], []>} : vector<8x128xbf16>, vector<128x128xbf16>, vector<8x128xf32> -> vector<8x128xf32>
    %c0_11 = arith.constant 0 : index
    %c0_12 = arith.constant 0 : index
    %c0_13 = arith.constant 0 : index
    %15 = vector.load %arg4[%c0_11, %c0_12, %c0_13] : memref<1x1x128xf32, #tpu.memory_space<vmem>>, vector<1x1x128xf32>
    %16 = vector.shape_cast %15 : vector<1x1x128xf32> to vector<1x128xf32>
    %17 = vector.broadcast %16 : vector<1x128xf32> to vector<8x128xf32>
    %18 = arith.addf %14, %17 : vector<8x128xf32>
    %cst_14 = arith.constant dense<0xFF800000> : vector<8xf32>
    %19 = vector.multi_reduction <maximumf>, %18, %cst_14 [1] : vector<8x128xf32> to vector<8xf32>
    %20 = vector.shape_cast %19 : vector<8xf32> to vector<8x1xf32>
    %21 = vector.broadcast %20 : vector<8x1xf32> to vector<8x128xf32>
    %22 = arith.subf %18, %21 : vector<8x128xf32>
    %23 = math.exp %22 : vector<8x128xf32>
    %cst_15 = arith.constant dense<0.000000e+00> : vector<8xf32>
    %24 = vector.multi_reduction <add>, %23, %cst_15 [1] : vector<8x128xf32> to vector<8xf32>
    %25 = vector.shape_cast %24 : vector<8xf32> to vector<8x1xf32>
    %26 = tpu.reciprocal %25 {approx = true} : vector<8x1xf32> -> vector<8x1xf32>
    %27 = vector.broadcast %26 : vector<8x1xf32> to vector<8x128xf32>
    %28 = arith.mulf %23, %27 : vector<8x128xf32>
    %29 = arith.truncf %28 : vector<8x128xf32> to vector<8x128xbf16>
    %c0_16 = arith.constant 0 : index
    %c0_17 = arith.constant 0 : index
    %c0_18 = arith.constant 0 : index
    %30 = vector.load %arg3[%c0_16, %c0_17, %c0_18] : memref<1x128x32xbf16, #tpu.memory_space<vmem>>, vector<1x128x32xbf16>
    %31 = vector.shape_cast %30 : vector<1x128x32xbf16> to vector<128x32xbf16>
    %cst_19 = arith.constant dense<0.000000e+00> : vector<8x32xf32>
    %32 = tpu.matmul %29, %31, %cst_19 {dimension_numbers = #tpu.dot_dimension_numbers<[1], [0], [0], [1], [0, 0, 1, 1], [], []>} : vector<8x128xbf16>, vector<128x32xbf16>, vector<8x32xf32> -> vector<8x32xf32>
    %c0_20 = arith.constant 0 : index
    %c0_21 = arith.constant 0 : index
    %c0_22 = arith.constant 0 : index
    %33 = vector.load %arg10[%c0_20, %c0_21, %c0_22] : memref<1x8x32xf32, #tpu.memory_space<vmem>>, vector<1x8x32xf32>
    %34 = vector.shape_cast %33 : vector<1x8x32xf32> to vector<8x32xf32>
    %35 = vector.shape_cast %32 : vector<8x32xf32> to vector<1x8x32xf32>
    tpu.vector_store %arg10[%c0_20, %c0_21, %c0_22], %35 {strides = array<i32>} : memref<1x8x32xf32, #tpu.memory_space<vmem>>, vector<1x8x32xf32>,
    %36 = arith.truncf %28 : vector<8x128xf32> to vector<8x128xbf16>
    %c0_23 = arith.constant 0 : index
    %c0_24 = arith.constant 0 : index
    %c0_25 = arith.constant 0 : index
    %37 = vector.load %arg11[%c0_23, %c0_24, %c0_25] : memref<1x8x128xbf16, #tpu.memory_space<vmem>>, vector<1x8x128xbf16>
    %38 = vector.shape_cast %37 : vector<1x8x128xbf16> to vector<8x128xbf16>
    %39 = vector.shape_cast %36 : vector<8x128xbf16> to vector<1x8x128xbf16>
    tpu.vector_store %arg11[%c0_23, %c0_24, %c0_25], %39 {strides = array<i32>} : memref<1x8x128xbf16, #tpu.memory_space<vmem>>, vector<1x8x128xbf16>,
    return
  }
  func.func @transform_0(%arg0: i32, %arg1: i32) -> (i32, i32, i32) {
    %c0_i32 = arith.constant 0 : i32
    %c0_i32_0 = arith.constant 0 : i32
    return %arg0, %arg1, %c0_i32 : i32, i32, i32
  }
  func.func @transform_1(%arg0: i32, %arg1: i32) -> (i32, i32, i32) {
    %c0_i32 = arith.constant 0 : i32
    %c0_i32_0 = arith.constant 0 : i32
    %c0_i32_1 = arith.constant 0 : i32
    return %arg0, %c0_i32, %c0_i32_0 : i32, i32, i32
  }
  func.func @transform_2(%arg0: i32, %arg1: i32) -> (i32, i32, i32) {
    %c0_i32 = arith.constant 0 : i32
    %c0_i32_0 = arith.constant 0 : i32
    %c0_i32_1 = arith.constant 0 : i32
    return %arg0, %c0_i32, %c0_i32_0 : i32, i32, i32
  }
  func.func @transform_3(%arg0: i32, %arg1: i32) -> (i32, i32) {
    %c0_i32 = arith.constant 0 : i32
    %c0_i32_0 = arith.constant 0 : i32
    %c0_i32_1 = arith.constant 0 : i32
    return %c0_i32, %c0_i32_0 : i32, i32
  }
  func.func @transform_4(%arg0: i32, %arg1: i32) -> (i32, i32) {
    %c0_i32 = arith.constant 0 : i32
    %c0_i32_0 = arith.constant 0 : i32
    %c0_i32_1 = arith.constant 0 : i32
    return %c0_i32, %c0_i32_0 : i32, i32
  }
  func.func @transform_5(%arg0: i32, %arg1: i32) -> (i32, i32) {
    %c0_i32 = arith.constant 0 : i32
    %c0_i32_0 = arith.constant 0 : i32
    %c0_i32_1 = arith.constant 0 : i32
    return %c0_i32, %c0_i32_0 : i32, i32
  }
  func.func @transform_6(%arg0: i32, %arg1: i32) -> (i32, i32) {
    %c0_i32 = arith.constant 0 : i32
    %c0_i32_0 = arith.constant 0 : i32
    %c0_i32_1 = arith.constant 0 : i32
    return %c0_i32, %c0_i32_0 : i32, i32
  }
  func.func @transform_7(%arg0: i32, %arg1: i32) -> (i32, i32) {
    %c0_i32 = arith.constant 0 : i32
    %c0_i32_0 = arith.constant 0 : i32
    %c0_i32_1 = arith.constant 0 : i32
    return %c0_i32, %c0_i32_0 : i32, i32
  }
  func.func @transform_8(%arg0: i32, %arg1: i32) -> (i32, i32, i32) {
    %c0_i32 = arith.constant 0 : i32
    %c0_i32_0 = arith.constant 0 : i32
    return %arg0, %arg1, %c0_i32 : i32, i32, i32
  }
  func.func @transform_9(%arg0: i32, %arg1: i32) -> (i32, i32, i32) {
    %c0_i32 = arith.constant 0 : i32
    %c0_i32_0 = arith.constant 0 : i32
    return %arg0, %arg1, %c0_i32 : i32, i32, i32
  }
}

</mosaic_0001>

<bundles_post_ra>
// kernel: tpu_custom_call.1
= control target key start
LH: loop header
LB: loop body
LE: loop exit
PB: predicated region body
PF: predicated region fallthrough
CT: control target
= control target key end

     0   :  { %s1923_s0 = inlined_call_operand.vmem [shape: bf16[2,8,32], index: 0, kind: input, shape index: {}]   ;;  %s1924_s1 = inlined_call_operand.vmem [shape: bf16[2,128,32], index: 1, kind: input, shape index: {}]   ;;  %s1925_s2 = inlined_call_operand.vmem [shape: f32[2,1,128], index: 2, kind: input, shape index: {}]   ;;  %s1926_s3 = inlined_call_operand.vmem [shape: bf16[32,128], index: 3, kind: input, shape index: {}]   ;;  %s1927_s4 = inlined_call_operand.vmem [shape: f32[1,128], index: 4, kind: input, shape index: {}]   ;;  %s1928_s5 = inlined_call_operand.vmem [shape: bf16[32,128], index: 5, kind: input, shape index: {}]   ;;  %s1929_s6 = inlined_call_operand.vmem [shape: f32[1,128], index: 6, kind: input, shape index: {}]   ;;  %s1930_s7 = inlined_call_operand.vmem [shape: bf16[128,128], index: 7, kind: input, shape index: {}]   ;;  %s1931_s8 = inlined_call_operand.hbm [shape: f32[2,8,32], index: 8, kind: output, shape index: {0}]   ;;  %s1932_s9 = inlined_call_operand.hbm [shape: bf16[2,8,128], index: 9, kind: output, shape index: {1}]  }
   0x1   :  { %1933 = sst [smem:[#allocation9_spill]] %s1923_s0 }
   0x2   :  { %1934 = sst [smem:[#allocation10_spill]] %s1924_s1 }
   0x3   :  { %15 = vsyncpa [#allocation4], 0 }
   0x4   :  { %17 = vsyncpa [#allocation4 + $0x1], 0 }
   0x5   :  { %18 = vsyncpa [#allocation6], 0 }
   0x6   :  { %20 = vsyncpa [#allocation6 + $0x1], 0  ;;  %s1677_s30 = smov 0   ;;  %s1679_s10 = smov 0  }
   0x7   :  { %s1681_s11 = smov 0   ;;  %s1683_s12 = smov 0  }
   0x8   :  { %s1685_s13 = smov 0   ;;  %s1687_s14 = smov 0  }
   0x9 LB: > { %s1213_s15 = sadd.s32 4294967295, %s1621_s14   ;;  %s1214_s16 = sadd.s32 4294967294, %s1621_s14   ;;  %s1621_s14 = sphi %s1687_s14, %s26_s14   ;;  %s1617_s13 = sphi %s1685_s13, %s1943_s13   ;;  %s1613_s12 = sphi %s1683_s12, %s1942_s12   ;;  %s1609_s11 = sphi %s1681_s11, %s1941_s11   ;;  %s1605_s10 = sphi %s1679_s10, %s1940_s10   ;;  %s1601_s30 = sphi %s1677_s30, %s1939_s30  }
   0xa   : > { %s38_s17 = sadd.s32 1, %s1617_s13  ;;  %s232_s18 = sadd.s32 1, %s1609_s11 }
   0xb   : > { %p40_p0 = scmp.ge.s32.totalorder %s38_s17, 2  ;;  %p242_p1 = scmp.ne.s32.totalorder %s1609_s11, %s1605_s10 }
   0xc   : > { %p243_p2 = scmp.eq.s32.totalorder %s1213_s15, 1  ;;  %p248_p3 = scmp.ne.s32.totalorder %s1605_s10, %s1601_s30 }
   0xd   : > { %s1945_s17 = smov (%p40_p0, %s38_s17), 0  ;;  %p249_p5 = scmp.eq.s32.totalorder %s1214_s16, 1 }
   0xe   : > { %p1717_p4 = por %p243_p2, %p242_p1  ;;  %s227_s20 = ssub.s32 %s1617_s13, %s1945_s17 }
   0xf   : > { %p1217_p6 = scmp.ge.s32.totalorder %s1621_s14, 1  ;;  %p230_p7 = scmp.eq.s32.totalorder %s227_s20, 0 }
  0x10   : > { %p1724_p8 = por %p249_p5, %p248_p3  ;;  %p334_p9 = scmp.lt.s32.totalorder %s1621_s14, 3 }
  0x11   : > { %s1730_s22 = scalar_select %p230_p7, %s1609_s11, %s232_s18  }
  0x12   : > { %p335_p10 = pnand %p1217_p6, %p334_p9 }
  0x13   : > { %v1479_v0 = vld [vmem:[%s1928_s5] sm:$0xff] (!%p335_p10)   ;;  %p385_p11 = scmp.lt.s32.totalorder (!%p335_p10), %s1613_s12, 1  ;;  %v1480_v1 = vld [vmem:[%s1928_s5 + $0x8] sm:$0xff] (!%p335_p10)   ;;  %vm484_vm0 = vcmask (!%p335_p10), 261120   ;;  %s1937_s1 = sld [smem:[#allocation10_spill]] (!%p335_p10)  ;;  %v1623_v12 = vmov (!%p335_p10), 0.0  }
  0x14   : > { %338 = sbr.rel (%p335_p10) target bundleno = 1321 (0x529), region = 52  ;;  %1317 = vmatprep.subr.bf16.mxu0 (!%p335_p10), %v1479_v0  ;;  %v1489_v10 = vld [vmem:[%s1926_s3] sm:$0xff] (!%p335_p10)   ;;  %v1494_v13 = vld [vmem:[%s1926_s3 + $0x8] sm:$0xff] (!%p335_p10)   ;;  %vm1624_vm1 = vmmov (!%p335_p10), 0   ;;  %s1938_s0 = sld [smem:[#allocation9_spill]] (!%p335_p10) }
  0x15   : > { %1318 = vmatpush3.bf16.msra.mxu0 (!%p335_p10), %v1479_v0  ;;  %v1490_v11 = vld [vmem:[%s1930_s7] sm:$0xff] (!%p335_p10)   ;;  %s1266_s25 = sshll.u32 (!%p335_p10), %s1613_s12, 6 }
  0x16   : > { %1319 = vmatprep.subr.bf16.mxu0 (!%p335_p10), %v1480_v1  ;;  %1353 = vmatprep.mubr.bf16.mxu1 (!%p335_p10), %v1490_v11  ;;  %v1223_v15 = vld [vmem:[%s1929_s6] ss:$0 sm:$0xff] (!%p335_p10) }
  0x17   : > { %v1495_v11 = vld [vmem:[%s1930_s7 + $0x20] sm:$0xff] (!%p335_p10)  }
  0x19   : > { %1320 = vmatpush3.bf16.msra.mxu0 (!%p335_p10), %v1480_v1 }
  0x1a   : > { %1369 = vmatprep.subr.bf16.mxu0 (!%p335_p10), %v1623_v12 }
  0x1b   : > { %s1740_s27 = scalar_select %p385_p11, %s1613_s12, 1 }
  0x1d   : > { %s1269_s28 = sshll.u32 %s1740_s27, 6  ;;  %s399_s20 = scalar_lea.vmem %s1925_s2, %s1740_s27 }
  0x1e   : > { %s1746_s16 = scalar_lea.vmem %s1937_s1, %s1269_s28  ;;  %s1220_s28 = sshll.u32 %s1740_s27, 2 }
  0x1f   : > { %v1481_v2 = vld [vmem:[%s1746_s16] sm:$0xff]   ;;  %v1482_v3 = vld [vmem:[%s1746_s16 + $0x8] sm:$0xff]   ;;  %v1483_v4 = vld [vmem:[%s1746_s16 + $0x10] sm:$0xff]   ;;  %s391_s18 = scalar_lea.vmem %s1938_s0, %s1220_s28  ;;  %s1842_s27 = sand.u32 1, %s1605_s10  }
  0x20   : > { %1321 = vmatprep.mubr.msk.bf16.mxu0 %vm484_vm0, %v1481_v2  ;;  %v1484_v5 = vld [vmem:[%s1746_s16 + $0x18] sm:$0xff]   ;;  %v1485_v6 = vld [vmem:[%s1746_s16 + $0x20] sm:$0xff]   ;;  %v1486_v7 = vld [vmem:[%s1746_s16 + $0x28] sm:$0xff]   ;;  %s1219_s23 = sshll.u32 %s1842_s27, 2  ;;  %s1054_s29 = scalar_lea.sflag [#allocation6], %s1842_s27 }
  0x21   : > { %1322 = vmatmul.mubr.msk.bf16.vlgmr.msra.gmra.mrb[0].mxu0 %vm484_vm0, %v1482_v3  ;;  %v1487_v8 = vld [vmem:[%s1746_s16 + $0x30] sm:$0xff]   ;;  %v1488_v9 = vld [vmem:[%s1746_s16 + $0x38] sm:$0xff]   ;;  %v807_v14 = vld [vmem:[%s391_s18] sm:$0xf]  ;;  %s384_s24 = scalar_lea.vmem [#allocation5], %s1219_s23  ;;  %s1625_s18 = smov [#allocation5]  }
  0x22   : > { %1325 = vmatprep.mubr.msk.bf16.mxu0 %vm484_vm0, %v1483_v4  ;;  %1370 = vmatpush3.bf16.msra.mxu0 %v1489_v10  ;;  %v1493_v10 = vld [vmem:[%s1930_s7 + $0x18] sm:$0xff]   ;;  %s1082_s26 = sshll.u32 %s384_s24, 4  ;;  %s1083_s26 = int_to_ptr.vmem [resolvable:$true] %s1082_s26 }
  0x23   : > { %1371 = vmatprep.subr.bf16.mxu0 %v1623_v12  ;;  %s1511_s15 = scalar_lea.vmem %s1083_s26, 64 }
  0x24   : > { %p1512_p12 = scmp.ne.s32.totalorder %s1083_s26, %s1511_s15 }
  0x26   : > { %1372 = vmatpush3.bf16.msra.mxu0 %v1494_v13  ;;  %v1496_v13 = vld [vmem:[%s1930_s7 + $0x28] sm:$0xff]   ;;  %p1513_p13 = pnand %p1512_p12, %p1717_p4 }
  0x27   : > { %1377 = vmatprep.subr.bf16.mxu0 %v1623_v12 }
  0x28   : > { %p1514_p0 = pneg %p1513_p13 }
  0x29   : > { %1326 = vmatmul.mubr.msk.bf16.gmra.mrb[4].mxu0 %vm484_vm0, %v1484_v5 }
  0x2a   : > { %1329 = vmatprep.mubr.msk.bf16.mxu0 %vm484_vm0, %v1485_v6 }
  0x31   : > { %1330 = vmatmul.mubr.msk.bf16.gmra.mrb[8].mxu0 %vm484_vm0, %v1486_v7 }
  0x32   : > { %1333 = vmatprep.mubr.msk.bf16.mxu0 %vm484_vm0, %v1487_v8  ;;  %v1491_v8 = vld [vmem:[%s1930_s7 + $0x8] sm:$0xff]  }
  0x39   : > { %1334 = vmatmul.mubr.msk.bf16.gmra.mrb[12].mxu0 %vm484_vm0, %v1488_v9  ;;  %v1492_v9 = vld [vmem:[%s1930_s7 + $0x10] sm:$0xff]  }
  0x3a   : > { %1373 = vmatprep.mubr.msk.bf16.mxu0 %vm1624_vm1, %v1623_v12 }
  0x41   : > { %1374 = vmatmul.mubr.msk.bf16.vlgmr.msra.gmra.mrb[16].mxu0 %vm484_vm0, %v807_v14  ;;  %v1497_v14 = vld [vmem:[%s1930_s7 + $0x30] sm:$0xff]  }
  0x42   : > { %1393 = vmatprep.mubr.msk.bf16.mxu0 %vm1624_vm1, %v1623_v12 }
  0xf4   : > { %v1323_v16 = vpop.f32.mrb[0].mxu0 }
  0xf5   : > { %v552_v17 = vadd.f32 %v1323_v16, %v1223_v15  ;;  %v543_v18 = vpop.f32.mrb[1].mxu0 }
  0xf6   : > { %v544_v19 = vadd.f32 %v1223_v15, %v543_v18  ;;  %v1324_v20 = vpop.f32.mrb[2].mxu0 }
  0xf7   : > { %v555_v21 = vadd.f32 %v1324_v20, %v1223_v15  ;;  %v546_v22 = vpop.f32.mrb[3].mxu0  ;;  %v608_v24 = vmax.f32 %v552_v17, 0.0 }
  0xf8   : > { %v547_v23 = vadd.f32 %v1223_v15, %v546_v22  ;;  %v606_v26 = vmax.f32 %v544_v19, 0.0 }
  0xf9   : > { %v609_v25 = vmax.f32 %v555_v21, 0.0 }
  0xfa   : > { %v607_v27 = vmax.f32 %v547_v23, 0.0 }
  0xfb   : > { %v639_v28 = vpack.c.bf16 %v609_v25, %v608_v24 }
  0xfc   : > { %v638_v29 = vpack.c.bf16 %v607_v27, %v606_v26  ;;  %v1327_v30 = vpop.f32.mrb[4].mxu0 }
  0xfd   : > { %v568_v31 = vadd.f32 %v1327_v30, %v1223_v15  ;;  %v559_v32 = vpop.f32.mrb[5].mxu0 }
  0xfe   : > { %1337 = vmatprep.subr.bf16.mxu1 %v638_v29  ;;  %v560_v33 = vadd.f32 %v1223_v15, %v559_v32  ;;  %v1328_v34 = vpop.f32.mrb[6].mxu0 }
  0xff   : > { %1338 = vmatpush3.bf16.xpose.msra.mxu1 %v638_v29  ;;  %v612_v35 = vmax.f32 %v568_v31, 0.0  ;;  %v571_v36 = vadd.f32 %v1328_v34, %v1223_v15  ;;  %v562_v37 = vpop.f32.mrb[7].mxu0 }
 0x100   : > { %1339 = vmatprep.subr.bf16.mxu1 %v639_v28  ;;  %v610_v38 = vmax.f32 %v560_v33, 0.0  ;;  %v563_v39 = vadd.f32 %v1223_v15, %v562_v37 }
 0x101   : > { %v613_v40 = vmax.f32 %v571_v36, 0.0 }
 0x102   : > { %v611_v41 = vmax.f32 %v563_v39, 0.0 }
 0x103   : > { %v641_v42 = vpack.c.bf16 %v613_v40, %v612_v35 }
 0x104   : > { %v640_v43 = vpack.c.bf16 %v611_v41, %v610_v38  ;;  %v1331_v44 = vpop.f32.mrb[8].mxu0  ;;  %v1250_v38 = vld [vmem:[%s1927_s4] ss:$0 sm:$0xff] }
 0x105   : > { %v584_v45 = vadd.f32 %v1331_v44, %v1223_v15  ;;  %v575_v46 = vpop.f32.mrb[9].mxu0 }
 0x106   : > { %v576_v47 = vadd.f32 %v1223_v15, %v575_v46  ;;  %v1332_v48 = vpop.f32.mrb[10].mxu0 }
 0x107   : > { %1340 = vmatpush3.bf16.xpose.msra.mxu1 %v639_v28  ;;  %v616_v49 = vmax.f32 %v584_v45, 0.0  ;;  %v587_v50 = vadd.f32 %v1332_v48, %v1223_v15  ;;  %v578_v51 = vpop.f32.mrb[11].mxu0  ;;  %v1254_v48 = vld [vmem:[%s399_s20] ss:$0 sm:$0xff]  ;;  %s1515_s20 = sshll.u32 %s1625_s18, 4  ;;  %s1516_s20 = int_to_ptr.vmem [resolvable:$false] %s1515_s20 }
 0x108   : > { %1341 = vmatprep.subr.bf16.mxu1 %v640_v43  ;;  %v614_v52 = vmax.f32 %v576_v47, 0.0  ;;  %v579_v53 = vadd.f32 %v1223_v15, %v578_v51  ;;  %s1517_s1 = scalar_lea.vmem %s1516_s20, 128  ;;  %p1518_p1 = scmp.lt.s32.totalorder %s1083_s26, %s1516_s20 }
 0x109   : > { %v617_v54 = vmax.f32 %v587_v50, 0.0  ;;  %p1519_p2 = scmp.lt.s32.totalorder %s1517_s1, %s1511_s15 }
 0x10a   : > { %v615_v55 = vmax.f32 %v579_v53, 0.0 }
 0x10b   : > { %v643_v56 = vpack.c.bf16 %v617_v54, %v616_v49  ;;  %v1499_v54 = vld [vmem:[%s1746_s16] sm:$0xff]   ;;  %p1520_p3 = por %p1519_p2, %p1518_p1 }
 0x10c   : > { %v642_v57 = vpack.c.bf16 %v615_v55, %v614_v52  ;;  %v1335_v58 = vpop.f32.mrb[12].mxu0  ;;  %v1500_v55 = vld [vmem:[%s1746_s16 + $0x8] sm:$0xff]  }
 0x10d   : > { %v600_v59 = vadd.f32 %v1335_v58, %v1223_v15  ;;  %v591_v60 = vpop.f32.mrb[13].mxu0  ;;  %v1503_v58 = vld [vmem:[%s1746_s16 + $0x20] sm:$0xff]   ;;  %p1521_p5 = pnand %p1520_p3, %p1514_p0 }
 0x10e   : > { %v592_v61 = vadd.f32 %v1223_v15, %v591_v60  ;;  %v1336_v62 = vpop.f32.mrb[14].mxu0 }
 0x10f   : > { %1342 = vmatpush3.bf16.xpose.msra.mxu1 %v640_v43  ;;  %v620_v63 = vmax.f32 %v600_v59, 0.0  ;;  %v603_v0 = vadd.f32 %v1336_v62, %v1223_v15  ;;  %v594_v1 = vpop.f32.mrb[15].mxu0 }
 0x110   : > { %1343 = vmatprep.subr.bf16.mxu1 %v641_v42  ;;  %v618_v2 = vmax.f32 %v592_v61, 0.0  ;;  %v595_v3 = vadd.f32 %v1223_v15, %v594_v1  ;;  %v1498_v15 = vld [vmem:[%s1930_s7 + $0x38] sm:$0xff]  }
 0x111   : > { %v621_v4 = vmax.f32 %v603_v0, 0.0  ;;  %v1505_v0 = vld [vmem:[%s1746_s16 + $0x30] sm:$0xff]   ;;  %v1506_v1 = vld [vmem:[%s1746_s16 + $0x38] sm:$0xff]  }
 0x112   : > { %v619_v5 = vmax.f32 %v595_v3, 0.0 }
 0x113   : > { %v645_v6 = vpack.c.bf16 %v621_v4, %v620_v63  ;;  %v1504_v63 = vld [vmem:[%s1746_s16 + $0x28] sm:$0xff]  }
 0x114   : > { %v644_v7 = vpack.c.bf16 %v619_v5, %v618_v2  ;;  %v869_v16 = vpop.f32.mrb[16].mxu0 }
 0x115   : > { %v1375_v17 = vpop.f32.mrb[17].mxu0  ;;  %v870_v41 = vadd.f32 %v1250_v38, %v869_v16 }
 0x116   : > { %v872_v18 = vpop.f32.mrb[18].mxu0 }
 0x117   : > { %1344 = vmatpush3.bf16.xpose.msra.mxu1 %v641_v42  ;;  %v1376_v19 = vpop.f32.mrb[19].mxu0  ;;  %v875_v46 = vmax.f32 %v870_v41, 0.0 }
 0x118   : > { %1345 = vmatprep.subr.bf16.mxu1 %v642_v57 }
 0x119   : > { %v876_v47 = vpack.c.bf16 %v875_v46, %v875_v46 }
 0x11f   : > { %1346 = vmatpush3.bf16.xpose.msra.mxu1 %v642_v57  ;;  %v1502_v57 = vld [vmem:[%s1746_s16 + $0x18] sm:$0xff]  }
 0x120   : > { %1347 = vmatprep.subr.bf16.mxu1 %v643_v56 }
 0x127   : > { %1348 = vmatpush3.bf16.xpose.msra.mxu1 %v643_v56  ;;  %v1501_v56 = vld [vmem:[%s1746_s16 + $0x10] sm:$0xff]   ;;  %s1849_s16 = scalar_lea.hbm %s1932_s9, %s1266_s25 }
 0x128   : > { %1349 = vmatprep.subr.bf16.mxu1 %v644_v7 }
 0x12f   : > { %1350 = vmatpush3.bf16.xpose.msra.mxu1 %v644_v7 }
 0x130   : > { %1351 = vmatprep.subr.bf16.mxu1 %v645_v6 }
 0x137   : > { %1352 = vmatpush3.bf16.xpose.msra.mxu1 %v645_v6 }
 0x138   : > { %1397 = vmatprep.subr.bf16.mxu1 %v1623_v12 }
 0x13e   : > { %1354 = vmatmul.mubr.bf16.vlgmr.msra.gmra.mrb[0].mxu1 %v1491_v8 }
 0x13f   : > { %1357 = vmatprep.mubr.bf16.mxu1 %v1492_v9  ;;  %1398 = vmatpush3.bf16.msra.mxu1 %v1499_v54 }
 0x140   : > { %1399 = vmatprep.subr.bf16.mxu1 %v1623_v12 }
 0x143   : > { %1400 = vmatpush3.bf16.msra.mxu1 %v1500_v55 }
 0x144   : > { %1401 = vmatprep.subr.bf16.mxu1 %v1623_v12 }
 0x146   : > { %1358 = vmatmul.mubr.bf16.gmra.mrb[4].mxu1 %v1493_v10 }
 0x147   : > { %1361 = vmatprep.mubr.bf16.mxu1 %v1495_v11  ;;  %1402 = vmatpush3.bf16.msra.mxu1 %v1501_v56 }
 0x148   : > { %1403 = vmatprep.subr.bf16.mxu1 %v1623_v12 }
 0x14b   : > { %1404 = vmatpush3.bf16.msra.mxu1 %v1502_v57 }
 0x14c   : > { %1405 = vmatprep.subr.bf16.mxu1 %v1623_v12 }
 0x14e   : > { %1362 = vmatmul.mubr.bf16.gmra.mrb[8].mxu1 %v1496_v13 }
 0x14f   : > { %1365 = vmatprep.mubr.bf16.mxu1 %v1497_v14  ;;  %1406 = vmatpush3.bf16.msra.mxu1 %v1503_v58 }
 0x150   : > { %1407 = vmatprep.subr.bf16.mxu1 %v1623_v12 }
 0x153   : > { %1408 = vmatpush3.bf16.msra.mxu1 %v1504_v63 }
 0x154   : > { %1409 = vmatprep.subr.bf16.mxu1 %v1623_v12 }
 0x156   : > { %1366 = vmatmul.mubr.bf16.gmra.mrb[12].mxu1 %v1498_v15 }
 0x157   : > { %1413 = vmatprep.mubr.msk.bf16.mxu1 %vm1624_vm1, %v1623_v12  ;;  %1410 = vmatpush3.bf16.msra.mxu1 %v1505_v0 }
 0x158   : > { %1411 = vmatprep.subr.bf16.mxu1 %v1623_v12 }
 0x15b   : > { %1412 = vmatpush3.bf16.msra.mxu1 %v1506_v1 }
 0x211   : > { %v1355_v20 = vpop.f32.mrb[0].mxu1 }
 0x212   : > { %v728_v21 = vpop.f32.mrb[1].mxu1 }
 0x213   : > { %v1356_v22 = vpop.f32.mrb[2].mxu1 }
 0x214   : > { %v792_v23 = vpack.c.bf16 %v1356_v22, %v1355_v20  ;;  %v731_v24 = vpop.f32.mrb[3].mxu1 }
 0x215   : > { %v791_v25 = vpack.c.bf16 %v731_v24, %v728_v21 }
 0x217   : > { %1378 = vmatpush3.bf16.msra.mxu0 %v791_v25 }
 0x218   : > { %1379 = vmatprep.subr.bf16.mxu0 %v1623_v12 }
 0x219   : > { %v1359_v26 = vpop.f32.mrb[4].mxu1 }
 0x21a   : > { %v744_v27 = vpop.f32.mrb[5].mxu1 }
 0x21b   : > { %v1360_v28 = vpop.f32.mrb[6].mxu1  ;;  %1380 = vmatpush3.bf16.msra.mxu0 %v792_v23 }
 0x21c   : > { %v794_v29 = vpack.c.bf16 %v1360_v28, %v1359_v26  ;;  %v747_v30 = vpop.f32.mrb[7].mxu1  ;;  %1381 = vmatprep.subr.bf16.mxu0 %v1623_v12 }
 0x21d   : > { %v793_v31 = vpack.c.bf16 %v747_v30, %v744_v27 }
 0x21f   : > { %1382 = vmatpush3.bf16.msra.mxu0 %v793_v31 }
 0x220   : > { %1383 = vmatprep.subr.bf16.mxu0 %v1623_v12 }
 0x221   : > { %v1363_v32 = vpop.f32.mrb[8].mxu1 }
 0x222   : > { %v760_v33 = vpop.f32.mrb[9].mxu1 }
 0x223   : > { %v1364_v34 = vpop.f32.mrb[10].mxu1  ;;  %1384 = vmatpush3.bf16.msra.mxu0 %v794_v29 }
 0x224   : > { %v796_v35 = vpack.c.bf16 %v1364_v34, %v1363_v32  ;;  %v763_v36 = vpop.f32.mrb[11].mxu1  ;;  %1385 = vmatprep.subr.bf16.mxu0 %v1623_v12 }
 0x225   : > { %v795_v37 = vpack.c.bf16 %v763_v36, %v760_v33 }
 0x227   : > { %1386 = vmatpush3.bf16.msra.mxu0 %v795_v37 }
 0x228   : > { %1387 = vmatprep.subr.bf16.mxu0 %v1623_v12 }
 0x229   : > { %v1367_v39 = vpop.f32.mrb[12].mxu1 }
 0x22a   : > { %v776_v40 = vpop.f32.mrb[13].mxu1 }
 0x22b   : > { %v1368_v42 = vpop.f32.mrb[14].mxu1  ;;  %1388 = vmatpush3.bf16.msra.mxu0 %v796_v35 }
 0x22c   : > { %v798_v43 = vpack.c.bf16 %v1368_v42, %v1367_v39  ;;  %v779_v44 = vpop.f32.mrb[15].mxu1  ;;  %1389 = vmatprep.subr.bf16.mxu0 %v1623_v12 }
 0x22d   : > { %v797_v45 = vpack.c.bf16 %v779_v44, %v776_v40 }
 0x22f   : > { %1390 = vmatpush3.bf16.msra.mxu0 %v797_v45 }
 0x230   : > { %1391 = vmatprep.subr.bf16.mxu0 %v1623_v12 }
 0x233   : > { %1392 = vmatpush3.bf16.msra.mxu0 %v798_v43 }
 0x236   : > { %1394 = vmatmul.mubr.bf16.vlgmr.msra.gmra.mrb[20].mxu0 %v876_v47 }
 0x309   : > { %v926_v49 = vpop.f32.mrb[20].mxu0 }
 0x30a   : > { %v927_v50 = vadd.f32 %v1254_v48, %v926_v49  ;;  %v1395_v51 = vpop.f32.mrb[21].mxu0 }
 0x30b   : > { %v929_v52 = vpop.f32.mrb[22].mxu0 }
 0x30c   : > { %932 = vmax.xlane.f32.xlu0 %v927_v50  ;;  %v1396_v53 = vpop.f32.mrb[23].mxu0 }
 0x399   : > { %v933_v59 = vpop.xlane.xlu0 %932 }
 0x39a   : > { %v934_v60 = vsub.f32 %v927_v50, %v933_v59 }
 0x39c   : > { %v935_v61 = vmul.f32 1.442695, %v934_v60 }
 0x39e   : > { %1507 = vpow2.f32 %v935_v61 }
 0x3a8   : > { %v1508_v62 = vpop.eup %1507 }
 0x3a9   : > { %937 = vadd.xlane.f32.xlu0 %v1508_v62 }
 0x436   : > { %v938_v2 = vpop.xlane.xlu0 %937 }
 0x437   : > { %1509 = vrcp.f32 %v938_v2 }
 0x441   : > { %v1510_v3 = vpop.eup %1509 }
 0x442   : > { %v940_v4 = vmul.f32 %v1510_v3, %v1508_v62 }
 0x444   : > { %v941_v5 = vpack.c.bf16 %v940_v4, %v940_v4 }
 0x446   : > { %1414 = vmatmul.mubr.bf16.vlgmr.msra.gmra.mrb[16].mxu1 %v941_v5  ;;  %1047 = vst [vmem:[%s384_s24] sm:$0xf] %v941_v5 }
 0x447   : > { %1524 = shalt.err (!%p1521_p5)
}
 0x448   : > { %s1525_s23 = scalar_lea.hbm %s1849_s16, 64  ;;  %s1529_s28 = scalar_lea.hbm %s1932_s9, 128 }
 0x449   : > { %p1526_p6 = scmp.ne.s32.totalorder %s1849_s16, %s1525_s23  ;;  %p1530_p10 = scmp.lt.u32.totalorder %s1849_s16, %s1932_s9 }
 0x44a   : > { %p1531_p11 = scmp.lt.u32.totalorder %s1529_s28, %s1525_s23  ;;  %p1533_p13 = scmp.lt.u32.totalorder %s1525_s23, %s1849_s16 }
 0x44b   : > { %p1527_p7 = pnand %p1526_p6, %p1717_p4 }
 0x44c   : > { %p1532_p12 = por %p1531_p11, %p1530_p10 }
 0x44d   : > { %p1528_p9 = pneg %p1527_p7 }
 0x44e   : > { %p1534_p0 = por %p1533_p13, %p1532_p12 }
 0x450   : > { %p1535_p1 = pnand %p1534_p0, %p1528_p9 }
 0x452   : > { %1538 = shalt.err (!%p1535_p1)
}
 0x453   : > { %1418 = dma.vmem_to_hbm [thread:$0]  (%p1717_p4), %s1083_s26, 64, %s1849_s16, %s1054_s29  }
 0x454   : > { %s1218_s1 = sshll.u32 %s1842_s27, 3  ;;  %s1265_s15 = sshll.u32 %s1613_s12, 7 }
 0x455   : > { %s377_s20 = scalar_lea.vmem [#allocation3], %s1218_s1  ;;  %s1874_s28 = scalar_lea.hbm %s1931_s8, %s1265_s15 }
 0x456   : > { %s1068_s24 = sshll.u32 %s377_s20, 4  ;;  %s1049_s26 = scalar_lea.sflag [#allocation4], %s1842_s27  ;;  %s1876_s24 = int_to_ptr.vmem [resolvable:$true] %s1068_s24 }
 0x457   : > { %s1539_s16 = scalar_lea.vmem %s1876_s24, 128  ;;  %s1626_s12 = smov [#allocation3]  }
 0x458   : > { %p1540_p2 = scmp.ne.s32.totalorder %s1876_s24, %s1539_s16  ;;  %s1543_s29 = sshll.u32 %s1626_s12, 4  ;;  %s1544_s29 = int_to_ptr.vmem [resolvable:$false] %s1543_s29 }
 0x459   : > { %s1545_s23 = scalar_lea.vmem %s1544_s29, 256  ;;  %p1546_p6 = scmp.lt.s32.totalorder %s1876_s24, %s1544_s29 }
 0x45a   : > { %p1541_p3 = pnand %p1540_p2, %p1717_p4  ;;  %p1547_p7 = scmp.lt.s32.totalorder %s1545_s23, %s1539_s16 }
 0x45c   : > { %p1542_p5 = pneg %p1541_p3  ;;  %p1548_p9 = por %p1547_p7, %p1546_p6 }
 0x45e   : > { %p1549_p10 = pnand %p1548_p9, %p1542_p5 }
 0x519   : > { %v1040_v12 = vpop.f32.mrb[16].mxu1 }
 0x51a   : > { %1046 = vst.msk [vmem:[%s377_s20] sm:$0xff] %vm484_vm0, %v1040_v12  ;;  %v1415_v6 = vpop.f32.mrb[17].mxu1 }
 0x51b   : > { %v1043_v7 = vpop.f32.mrb[18].mxu1 }
 0x51c   : > { %1552 = shalt.err (!%p1549_p10)
}
 0x51d   : > { %s1553_s27 = scalar_lea.hbm %s1874_s28, 128  ;;  %s1557_s15 = scalar_lea.hbm %s1931_s8, 256 }
 0x51e   : > { %p1554_p11 = scmp.ne.s32.totalorder %s1874_s28, %s1553_s27  ;;  %p1558_p0 = scmp.lt.u32.totalorder %s1874_s28, %s1931_s8 }
 0x51f   : > { %p1559_p1 = scmp.lt.u32.totalorder %s1557_s15, %s1553_s27  ;;  %p1561_p3 = scmp.lt.u32.totalorder %s1553_s27, %s1874_s28 }
 0x520   : > { %p1555_p12 = pnand %p1554_p11, %p1717_p4 }
 0x521   : > { %p1560_p2 = por %p1559_p1, %p1558_p0 }
 0x522   : > { %p1556_p13 = pneg %p1555_p12 }
 0x523   : > { %p1562_p5 = por %p1561_p3, %p1560_p2 }
 0x525   : > { %p1563_p6 = pnand %p1562_p5, %p1556_p13 }
 0x527   : > { %1566 = shalt.err (!%p1563_p6)
}
 0x528   : > { %1417 = dma.vmem_to_hbm [thread:$0]  (%p1717_p4), %s1876_s24, 128, %s1874_s28, %s1049_s26   ;;  %v1416_v8 = vpop.f32.mrb[19].mxu1 }
 0x529 PF: > { %p1428_p7 = scmp.ge.s32.totalorder %s1621_s14, 2  ;;  %s1094_s0 = sand.u32 1, %s1601_s30  }
 0x52a   : > { %s1095_s16 = scalar_lea.sflag [#allocation4], %s1094_s0 }
 0x52b   : > { %p1422_p9 = pnand %p1428_p7, %p1724_p8 }
 0x52d   : > { %1592 = dma.done.wait (!%p1422_p9), %s1095_s16, 128  }
 0x52e   : > { %1594 = vsyncadd (!%p1422_p9), %s1095_s16, 4294967168  ;;  %s1104_s12 = scalar_lea.sflag [#allocation6], %s1094_s0 }
 0x52f   : > { %1596 = dma.done.wait (!%p1422_p9), %s1104_s12, 64  }
 0x530   : > { %1598 = vsyncadd (!%p1422_p9), %s1104_s12, 4294967232  ;;  %s26_s14 = sadd.s32 1, %s1621_s14   ;;  %s1939_s30 = smov %s1605_s10 }
 0x531   : > { %p23_p10 = scmp.ge.s32.totalorder %s26_s14, 4   ;;  %s1940_s10 = smov %s1609_s11 }
 0x532   : > { %s1941_s11 = smov %s1730_s22  ;;  %s1942_s12 = smov %s1617_s13 }
 0x533   : > { %s1943_s13 = smov %s1945_s17  ;;  %25 = sbr.rel (!%p23_p10) target bundleno = 9 (0x9), region = 114 }
 0x53a   :  { %1109 = vsyncpa [#allocation4], 1 }
 0x53b   :  { %1111 = vsyncpa [#allocation4 + $0x1], 1 }
 0x53c   :  { %1112 = vsyncpa [#allocation6], 1 }
 0x53d   :  { %1114 = vsyncpa [#allocation6 + $0x1], 1 }

// kernel: tpu_custom_call.1
= control target key start
LH: loop header
LB: loop body
LE: loop exit
PB: predicated region body
PF: predicated region fallthrough
CT: control target
= control target key end

     0   :  { %s1917_s0 = inlined_call_operand.vmem [shape: bf16[2,8,32], index: 0, kind: input, shape index: {}]   ;;  %s1918_s1 = inlined_call_operand.vmem [shape: bf16[2,128,32], index: 1, kind: input, shape index: {}]   ;;  %s1919_s2 = inlined_call_operand.vmem [shape: f32[2,1,128], index: 2, kind: input, shape index: {}]   ;;  %s1920_s3 = inlined_call_operand.vmem [shape: bf16[32,128], index: 3, kind: input, shape index: {}]   ;;  %s1921_s4 = inlined_call_operand.vmem [shape: f32[1,128], index: 4, kind: input, shape index: {}]   ;;  %s1922_s5 = inlined_call_operand.vmem [shape: bf16[32,128], index: 5, kind: input, shape index: {}]   ;;  %s1923_s6 = inlined_call_operand.vmem [shape: f32[1,128], index: 6, kind: input, shape index: {}]   ;;  %s1924_s7 = inlined_call_operand.vmem [shape: bf16[128,128], index: 7, kind: input, shape index: {}]   ;;  %s1925_s8 = inlined_call_operand.hbm [shape: f32[2,8,32], index: 8, kind: output, shape index: {0}]   ;;  %s1926_s9 = inlined_call_operand.hbm [shape: bf16[2,8,128], index: 9, kind: output, shape index: {1}]  }
   0x1   :  { %1927 = sst [smem:[#allocation9_spill]] %s1917_s0 }
   0x2   :  { %1928 = sst [smem:[#allocation10_spill]] %s1918_s1 }
   0x3   :  { %15 = vsyncpa [#allocation4], 0 }
   0x4   :  { %17 = vsyncpa [#allocation4 + $0x1], 0 }
   0x5   :  { %18 = vsyncpa [#allocation6], 0 }
   0x6   :  { %20 = vsyncpa [#allocation6 + $0x1], 0  ;;  %s1671_s30 = smov 0   ;;  %s1673_s10 = smov 0  }
   0x7   :  { %s1675_s11 = smov 0   ;;  %s1677_s12 = smov 0  }
   0x8   :  { %s1679_s13 = smov 0   ;;  %s1681_s14 = smov 0  }
   0x9 LB: > { %s1207_s15 = sadd.s32 4294967295, %s1615_s14   ;;  %s1208_s16 = sadd.s32 4294967294, %s1615_s14   ;;  %s1615_s14 = sphi %s1681_s14, %s26_s14   ;;  %s1611_s13 = sphi %s1679_s13, %s1937_s13   ;;  %s1607_s12 = sphi %s1677_s12, %s1936_s12   ;;  %s1603_s11 = sphi %s1675_s11, %s1935_s11   ;;  %s1599_s10 = sphi %s1673_s10, %s1934_s10   ;;  %s1595_s30 = sphi %s1671_s30, %s1933_s30  }
   0xa   : > { %s38_s17 = sadd.s32 1, %s1611_s13  ;;  %s232_s18 = sadd.s32 1, %s1603_s11 }
   0xb   : > { %p40_p0 = scmp.ge.s32.totalorder %s38_s17, 2  ;;  %p242_p1 = scmp.ne.s32.totalorder %s1603_s11, %s1599_s10 }
   0xc   : > { %p243_p2 = scmp.eq.s32.totalorder %s1207_s15, 1  ;;  %p248_p3 = scmp.ne.s32.totalorder %s1599_s10, %s1595_s30 }
   0xd   : > { %s1939_s17 = smov (%p40_p0, %s38_s17), 0  ;;  %p249_p5 = scmp.eq.s32.totalorder %s1208_s16, 1 }
   0xe   : > { %p1711_p4 = por %p243_p2, %p242_p1  ;;  %s227_s20 = ssub.s32 %s1611_s13, %s1939_s17 }
   0xf   : > { %p1211_p6 = scmp.ge.s32.totalorder %s1615_s14, 1  ;;  %p230_p7 = scmp.eq.s32.totalorder %s227_s20, 0 }
  0x10   : > { %p1718_p8 = por %p249_p5, %p248_p3  ;;  %p334_p9 = scmp.lt.s32.totalorder %s1615_s14, 3 }
  0x11   : > { %s1724_s22 = scalar_select %p230_p7, %s1603_s11, %s232_s18  }
  0x12   : > { %p335_p10 = pnand %p1211_p6, %p334_p9 }
  0x13   : > { %v1473_v0 = vld [vmem:[%s1922_s5] sm:$0xff] (!%p335_p10)   ;;  %p385_p11 = scmp.lt.s32.totalorder (!%p335_p10), %s1607_s12, 1  ;;  %v1474_v1 = vld [vmem:[%s1922_s5 + $0x8] sm:$0xff] (!%p335_p10)   ;;  %vm484_vm0 = vcmask (!%p335_p10), 261120   ;;  %s1931_s1 = sld [smem:[#allocation10_spill]] (!%p335_p10)  ;;  %v1617_v12 = vmov (!%p335_p10), 0.0  }
  0x14   : > { %338 = sbr.rel (%p335_p10) target bundleno = 1321 (0x529), region = 52  ;;  %1311 = vmatprep.subr.bf16.mxu0 (!%p335_p10), %v1473_v0  ;;  %v1483_v10 = vld [vmem:[%s1920_s3] sm:$0xff] (!%p335_p10)   ;;  %v1488_v13 = vld [vmem:[%s1920_s3 + $0x8] sm:$0xff] (!%p335_p10)   ;;  %vm1618_vm1 = vmmov (!%p335_p10), 0   ;;  %s1932_s0 = sld [smem:[#allocation9_spill]] (!%p335_p10) }
  0x15   : > { %1312 = vmatpush3.bf16.msra.mxu0 (!%p335_p10), %v1473_v0  ;;  %v1484_v11 = vld [vmem:[%s1924_s7] sm:$0xff] (!%p335_p10)   ;;  %s1260_s25 = sshll.u32 (!%p335_p10), %s1607_s12, 6 }
  0x16   : > { %1313 = vmatprep.subr.bf16.mxu0 (!%p335_p10), %v1474_v1  ;;  %1347 = vmatprep.mubr.bf16.mxu1 (!%p335_p10), %v1484_v11  ;;  %v1217_v15 = vld [vmem:[%s1923_s6] ss:$0 sm:$0xff] (!%p335_p10) }
  0x17   : > { %v1489_v11 = vld [vmem:[%s1924_s7 + $0x20] sm:$0xff] (!%p335_p10)  }
  0x19   : > { %1314 = vmatpush3.bf16.msra.mxu0 (!%p335_p10), %v1474_v1 }
  0x1a   : > { %1363 = vmatprep.subr.bf16.mxu0 (!%p335_p10), %v1617_v12 }
  0x1b   : > { %s1734_s27 = scalar_select %p385_p11, %s1607_s12, 1 }
  0x1d   : > { %s1263_s28 = sshll.u32 %s1734_s27, 6  ;;  %s399_s20 = scalar_lea.vmem %s1919_s2, %s1734_s27 }
  0x1e   : > { %s1740_s16 = scalar_lea.vmem %s1931_s1, %s1263_s28  ;;  %s1214_s28 = sshll.u32 %s1734_s27, 2 }
  0x1f   : > { %v1475_v2 = vld [vmem:[%s1740_s16] sm:$0xff]   ;;  %v1476_v3 = vld [vmem:[%s1740_s16 + $0x8] sm:$0xff]   ;;  %v1477_v4 = vld [vmem:[%s1740_s16 + $0x10] sm:$0xff]   ;;  %s391_s18 = scalar_lea.vmem %s1932_s0, %s1214_s28  ;;  %s1836_s27 = sand.u32 1, %s1599_s10  }
  0x20   : > { %1315 = vmatprep.mubr.msk.bf16.mxu0 %vm484_vm0, %v1475_v2  ;;  %v1478_v5 = vld [vmem:[%s1740_s16 + $0x18] sm:$0xff]   ;;  %v1479_v6 = vld [vmem:[%s1740_s16 + $0x20] sm:$0xff]   ;;  %v1480_v7 = vld [vmem:[%s1740_s16 + $0x28] sm:$0xff]   ;;  %s1213_s23 = sshll.u32 %s1836_s27, 2  ;;  %s1054_s29 = scalar_lea.sflag [#allocation6], %s1836_s27 }
  0x21   : > { %1316 = vmatmul.mubr.msk.bf16.vlgmr.msra.gmra.mrb[0].mxu0 %vm484_vm0, %v1476_v3  ;;  %v1481_v8 = vld [vmem:[%s1740_s16 + $0x30] sm:$0xff]   ;;  %v1482_v9 = vld [vmem:[%s1740_s16 + $0x38] sm:$0xff]   ;;  %v807_v14 = vld [vmem:[%s391_s18] sm:$0xf]  ;;  %s384_s24 = scalar_lea.vmem [#allocation5], %s1213_s23  ;;  %s1619_s18 = smov [#allocation5]  }
  0x22   : > { %1319 = vmatprep.mubr.msk.bf16.mxu0 %vm484_vm0, %v1477_v4  ;;  %1364 = vmatpush3.bf16.msra.mxu0 %v1483_v10  ;;  %v1487_v10 = vld [vmem:[%s1924_s7 + $0x18] sm:$0xff]   ;;  %s1082_s26 = sshll.u32 %s384_s24, 4  ;;  %s1083_s26 = int_to_ptr.vmem [resolvable:$true] %s1082_s26 }
  0x23   : > { %1365 = vmatprep.subr.bf16.mxu0 %v1617_v12  ;;  %s1505_s15 = scalar_lea.vmem %s1083_s26, 64 }
  0x24   : > { %p1506_p12 = scmp.ne.s32.totalorder %s1083_s26, %s1505_s15 }
  0x26   : > { %1366 = vmatpush3.bf16.msra.mxu0 %v1488_v13  ;;  %v1490_v13 = vld [vmem:[%s1924_s7 + $0x28] sm:$0xff]   ;;  %p1507_p13 = pnand %p1506_p12, %p1711_p4 }
  0x27   : > { %1371 = vmatprep.subr.bf16.mxu0 %v1617_v12 }
  0x28   : > { %p1508_p0 = pneg %p1507_p13 }
  0x29   : > { %1320 = vmatmul.mubr.msk.bf16.gmra.mrb[4].mxu0 %vm484_vm0, %v1478_v5 }
  0x2a   : > { %1323 = vmatprep.mubr.msk.bf16.mxu0 %vm484_vm0, %v1479_v6 }
  0x31   : > { %1324 = vmatmul.mubr.msk.bf16.gmra.mrb[8].mxu0 %vm484_vm0, %v1480_v7 }
  0x32   : > { %1327 = vmatprep.mubr.msk.bf16.mxu0 %vm484_vm0, %v1481_v8  ;;  %v1485_v8 = vld [vmem:[%s1924_s7 + $0x8] sm:$0xff]  }
  0x39   : > { %1328 = vmatmul.mubr.msk.bf16.gmra.mrb[12].mxu0 %vm484_vm0, %v1482_v9  ;;  %v1486_v9 = vld [vmem:[%s1924_s7 + $0x10] sm:$0xff]  }
  0x3a   : > { %1367 = vmatprep.mubr.msk.bf16.mxu0 %vm1618_vm1, %v1617_v12 }
  0x41   : > { %1368 = vmatmul.mubr.msk.bf16.vlgmr.msra.gmra.mrb[16].mxu0 %vm484_vm0, %v807_v14  ;;  %v1491_v14 = vld [vmem:[%s1924_s7 + $0x30] sm:$0xff]  }
  0x42   : > { %1387 = vmatprep.mubr.msk.bf16.mxu0 %vm1618_vm1, %v1617_v12 }
  0xf4   : > { %v1317_v16 = vpop.f32.mrb[0].mxu0 }
  0xf5   : > { %v552_v17 = vadd.f32 %v1317_v16, %v1217_v15  ;;  %v543_v18 = vpop.f32.mrb[1].mxu0 }
  0xf6   : > { %v544_v19 = vadd.f32 %v1217_v15, %v543_v18  ;;  %v1318_v20 = vpop.f32.mrb[2].mxu0 }
  0xf7   : > { %v555_v21 = vadd.f32 %v1318_v20, %v1217_v15  ;;  %v546_v22 = vpop.f32.mrb[3].mxu0  ;;  %v608_v24 = vmax.f32 %v552_v17, 0.0 }
  0xf8   : > { %v547_v23 = vadd.f32 %v1217_v15, %v546_v22  ;;  %v606_v26 = vmax.f32 %v544_v19, 0.0 }
  0xf9   : > { %v609_v25 = vmax.f32 %v555_v21, 0.0 }
  0xfa   : > { %v607_v27 = vmax.f32 %v547_v23, 0.0 }
  0xfb   : > { %v639_v28 = vpack.c.bf16 %v609_v25, %v608_v24 }
  0xfc   : > { %v638_v29 = vpack.c.bf16 %v607_v27, %v606_v26  ;;  %v1321_v30 = vpop.f32.mrb[4].mxu0 }
  0xfd   : > { %v568_v31 = vadd.f32 %v1321_v30, %v1217_v15  ;;  %v559_v32 = vpop.f32.mrb[5].mxu0 }
  0xfe   : > { %1331 = vmatprep.subr.bf16.mxu1 %v638_v29  ;;  %v560_v33 = vadd.f32 %v1217_v15, %v559_v32  ;;  %v1322_v34 = vpop.f32.mrb[6].mxu0 }
  0xff   : > { %1332 = vmatpush3.bf16.xpose.msra.mxu1 %v638_v29  ;;  %v612_v35 = vmax.f32 %v568_v31, 0.0  ;;  %v571_v36 = vadd.f32 %v1322_v34, %v1217_v15  ;;  %v562_v37 = vpop.f32.mrb[7].mxu0 }
 0x100   : > { %1333 = vmatprep.subr.bf16.mxu1 %v639_v28  ;;  %v610_v38 = vmax.f32 %v560_v33, 0.0  ;;  %v563_v39 = vadd.f32 %v1217_v15, %v562_v37 }
 0x101   : > { %v613_v40 = vmax.f32 %v571_v36, 0.0 }
 0x102   : > { %v611_v41 = vmax.f32 %v563_v39, 0.0 }
 0x103   : > { %v641_v42 = vpack.c.bf16 %v613_v40, %v612_v35 }
 0x104   : > { %v640_v43 = vpack.c.bf16 %v611_v41, %v610_v38  ;;  %v1325_v44 = vpop.f32.mrb[8].mxu0  ;;  %v1244_v38 = vld [vmem:[%s1921_s4] ss:$0 sm:$0xff] }
 0x105   : > { %v584_v45 = vadd.f32 %v1325_v44, %v1217_v15  ;;  %v575_v46 = vpop.f32.mrb[9].mxu0 }
 0x106   : > { %v576_v47 = vadd.f32 %v1217_v15, %v575_v46  ;;  %v1326_v48 = vpop.f32.mrb[10].mxu0 }
 0x107   : > { %1334 = vmatpush3.bf16.xpose.msra.mxu1 %v639_v28  ;;  %v616_v49 = vmax.f32 %v584_v45, 0.0  ;;  %v587_v50 = vadd.f32 %v1326_v48, %v1217_v15  ;;  %v578_v51 = vpop.f32.mrb[11].mxu0  ;;  %v1248_v48 = vld [vmem:[%s399_s20] ss:$0 sm:$0xff]  ;;  %s1509_s20 = sshll.u32 %s1619_s18, 4  ;;  %s1510_s20 = int_to_ptr.vmem [resolvable:$false] %s1509_s20 }
 0x108   : > { %1335 = vmatprep.subr.bf16.mxu1 %v640_v43  ;;  %v614_v52 = vmax.f32 %v576_v47, 0.0  ;;  %v579_v53 = vadd.f32 %v1217_v15, %v578_v51  ;;  %s1511_s1 = scalar_lea.vmem %s1510_s20, 128  ;;  %p1512_p1 = scmp.lt.s32.totalorder %s1083_s26, %s1510_s20 }
 0x109   : > { %v617_v54 = vmax.f32 %v587_v50, 0.0  ;;  %p1513_p2 = scmp.lt.s32.totalorder %s1511_s1, %s1505_s15 }
 0x10a   : > { %v615_v55 = vmax.f32 %v579_v53, 0.0 }
 0x10b   : > { %v643_v56 = vpack.c.bf16 %v617_v54, %v616_v49  ;;  %v1493_v54 = vld [vmem:[%s1740_s16] sm:$0xff]   ;;  %p1514_p3 = por %p1513_p2, %p1512_p1 }
 0x10c   : > { %v642_v57 = vpack.c.bf16 %v615_v55, %v614_v52  ;;  %v1329_v58 = vpop.f32.mrb[12].mxu0  ;;  %v1494_v55 = vld [vmem:[%s1740_s16 + $0x8] sm:$0xff]  }
 0x10d   : > { %v600_v59 = vadd.f32 %v1329_v58, %v1217_v15  ;;  %v591_v60 = vpop.f32.mrb[13].mxu0  ;;  %v1497_v58 = vld [vmem:[%s1740_s16 + $0x20] sm:$0xff]   ;;  %p1515_p5 = pnand %p1514_p3, %p1508_p0 }
 0x10e   : > { %v592_v61 = vadd.f32 %v1217_v15, %v591_v60  ;;  %v1330_v62 = vpop.f32.mrb[14].mxu0 }
 0x10f   : > { %1336 = vmatpush3.bf16.xpose.msra.mxu1 %v640_v43  ;;  %v620_v63 = vmax.f32 %v600_v59, 0.0  ;;  %v603_v0 = vadd.f32 %v1330_v62, %v1217_v15  ;;  %v594_v1 = vpop.f32.mrb[15].mxu0 }
 0x110   : > { %1337 = vmatprep.subr.bf16.mxu1 %v641_v42  ;;  %v618_v2 = vmax.f32 %v592_v61, 0.0  ;;  %v595_v3 = vadd.f32 %v1217_v15, %v594_v1  ;;  %v1492_v15 = vld [vmem:[%s1924_s7 + $0x38] sm:$0xff]  }
 0x111   : > { %v621_v4 = vmax.f32 %v603_v0, 0.0  ;;  %v1499_v0 = vld [vmem:[%s1740_s16 + $0x30] sm:$0xff]   ;;  %v1500_v1 = vld [vmem:[%s1740_s16 + $0x38] sm:$0xff]  }
 0x112   : > { %v619_v5 = vmax.f32 %v595_v3, 0.0 }
 0x113   : > { %v645_v6 = vpack.c.bf16 %v621_v4, %v620_v63  ;;  %v1498_v63 = vld [vmem:[%s1740_s16 + $0x28] sm:$0xff]  }
 0x114   : > { %v644_v7 = vpack.c.bf16 %v619_v5, %v618_v2  ;;  %v869_v16 = vpop.f32.mrb[16].mxu0 }
 0x115   : > { %v1369_v17 = vpop.f32.mrb[17].mxu0  ;;  %v870_v41 = vadd.f32 %v1244_v38, %v869_v16 }
 0x116   : > { %v872_v18 = vpop.f32.mrb[18].mxu0 }
 0x117   : > { %1338 = vmatpush3.bf16.xpose.msra.mxu1 %v641_v42  ;;  %v1370_v19 = vpop.f32.mrb[19].mxu0  ;;  %v875_v46 = vmax.f32 %v870_v41, 0.0 }
 0x118   : > { %1339 = vmatprep.subr.bf16.mxu1 %v642_v57 }
 0x119   : > { %v876_v47 = vpack.c.bf16 %v875_v46, %v875_v46 }
 0x11f   : > { %1340 = vmatpush3.bf16.xpose.msra.mxu1 %v642_v57  ;;  %v1496_v57 = vld [vmem:[%s1740_s16 + $0x18] sm:$0xff]  }
 0x120   : > { %1341 = vmatprep.subr.bf16.mxu1 %v643_v56 }
 0x127   : > { %1342 = vmatpush3.bf16.xpose.msra.mxu1 %v643_v56  ;;  %v1495_v56 = vld [vmem:[%s1740_s16 + $0x10] sm:$0xff]   ;;  %s1843_s16 = scalar_lea.hbm %s1926_s9, %s1260_s25 }
 0x128   : > { %1343 = vmatprep.subr.bf16.mxu1 %v644_v7 }
 0x12f   : > { %1344 = vmatpush3.bf16.xpose.msra.mxu1 %v644_v7 }
 0x130   : > { %1345 = vmatprep.subr.bf16.mxu1 %v645_v6 }
 0x137   : > { %1346 = vmatpush3.bf16.xpose.msra.mxu1 %v645_v6 }
 0x138   : > { %1391 = vmatprep.subr.bf16.mxu1 %v1617_v12 }
 0x13e   : > { %1348 = vmatmul.mubr.bf16.vlgmr.msra.gmra.mrb[0].mxu1 %v1485_v8 }
 0x13f   : > { %1351 = vmatprep.mubr.bf16.mxu1 %v1486_v9  ;;  %1392 = vmatpush3.bf16.msra.mxu1 %v1493_v54 }
 0x140   : > { %1393 = vmatprep.subr.bf16.mxu1 %v1617_v12 }
 0x143   : > { %1394 = vmatpush3.bf16.msra.mxu1 %v1494_v55 }
 0x144   : > { %1395 = vmatprep.subr.bf16.mxu1 %v1617_v12 }
 0x146   : > { %1352 = vmatmul.mubr.bf16.gmra.mrb[4].mxu1 %v1487_v10 }
 0x147   : > { %1355 = vmatprep.mubr.bf16.mxu1 %v1489_v11  ;;  %1396 = vmatpush3.bf16.msra.mxu1 %v1495_v56 }
 0x148   : > { %1397 = vmatprep.subr.bf16.mxu1 %v1617_v12 }
 0x14b   : > { %1398 = vmatpush3.bf16.msra.mxu1 %v1496_v57 }
 0x14c   : > { %1399 = vmatprep.subr.bf16.mxu1 %v1617_v12 }
 0x14e   : > { %1356 = vmatmul.mubr.bf16.gmra.mrb[8].mxu1 %v1490_v13 }
 0x14f   : > { %1359 = vmatprep.mubr.bf16.mxu1 %v1491_v14  ;;  %1400 = vmatpush3.bf16.msra.mxu1 %v1497_v58 }
 0x150   : > { %1401 = vmatprep.subr.bf16.mxu1 %v1617_v12 }
 0x153   : > { %1402 = vmatpush3.bf16.msra.mxu1 %v1498_v63 }
 0x154   : > { %1403 = vmatprep.subr.bf16.mxu1 %v1617_v12 }
 0x156   : > { %1360 = vmatmul.mubr.bf16.gmra.mrb[12].mxu1 %v1492_v15 }
 0x157   : > { %1407 = vmatprep.mubr.msk.bf16.mxu1 %vm1618_vm1, %v1617_v12  ;;  %1404 = vmatpush3.bf16.msra.mxu1 %v1499_v0 }
 0x158   : > { %1405 = vmatprep.subr.bf16.mxu1 %v1617_v12 }
 0x15b   : > { %1406 = vmatpush3.bf16.msra.mxu1 %v1500_v1 }
 0x211   : > { %v1349_v20 = vpop.f32.mrb[0].mxu1 }
 0x212   : > { %v728_v21 = vpop.f32.mrb[1].mxu1 }
 0x213   : > { %v1350_v22 = vpop.f32.mrb[2].mxu1 }
 0x214   : > { %v792_v23 = vpack.c.bf16 %v1350_v22, %v1349_v20  ;;  %v731_v24 = vpop.f32.mrb[3].mxu1 }
 0x215   : > { %v791_v25 = vpack.c.bf16 %v731_v24, %v728_v21 }
 0x217   : > { %1372 = vmatpush3.bf16.msra.mxu0 %v791_v25 }
 0x218   : > { %1373 = vmatprep.subr.bf16.mxu0 %v1617_v12 }
 0x219   : > { %v1353_v26 = vpop.f32.mrb[4].mxu1 }
 0x21a   : > { %v744_v27 = vpop.f32.mrb[5].mxu1 }
 0x21b   : > { %v1354_v28 = vpop.f32.mrb[6].mxu1  ;;  %1374 = vmatpush3.bf16.msra.mxu0 %v792_v23 }
 0x21c   : > { %v794_v29 = vpack.c.bf16 %v1354_v28, %v1353_v26  ;;  %v747_v30 = vpop.f32.mrb[7].mxu1  ;;  %1375 = vmatprep.subr.bf16.mxu0 %v1617_v12 }
 0x21d   : > { %v793_v31 = vpack.c.bf16 %v747_v30, %v744_v27 }
 0x21f   : > { %1376 = vmatpush3.bf16.msra.mxu0 %v793_v31 }
 0x220   : > { %1377 = vmatprep.subr.bf16.mxu0 %v1617_v12 }
 0x221   : > { %v1357_v32 = vpop.f32.mrb[8].mxu1 }
 0x222   : > { %v760_v33 = vpop.f32.mrb[9].mxu1 }
 0x223   : > { %v1358_v34 = vpop.f32.mrb[10].mxu1  ;;  %1378 = vmatpush3.bf16.msra.mxu0 %v794_v29 }
 0x224   : > { %v796_v35 = vpack.c.bf16 %v1358_v34, %v1357_v32  ;;  %v763_v36 = vpop.f32.mrb[11].mxu1  ;;  %1379 = vmatprep.subr.bf16.mxu0 %v1617_v12 }
 0x225   : > { %v795_v37 = vpack.c.bf16 %v763_v36, %v760_v33 }
 0x227   : > { %1380 = vmatpush3.bf16.msra.mxu0 %v795_v37 }
 0x228   : > { %1381 = vmatprep.subr.bf16.mxu0 %v1617_v12 }
 0x229   : > { %v1361_v39 = vpop.f32.mrb[12].mxu1 }
 0x22a   : > { %v776_v40 = vpop.f32.mrb[13].mxu1 }
 0x22b   : > { %v1362_v42 = vpop.f32.mrb[14].mxu1  ;;  %1382 = vmatpush3.bf16.msra.mxu0 %v796_v35 }
 0x22c   : > { %v798_v43 = vpack.c.bf16 %v1362_v42, %v1361_v39  ;;  %v779_v44 = vpop.f32.mrb[15].mxu1  ;;  %1383 = vmatprep.subr.bf16.mxu0 %v1617_v12 }
 0x22d   : > { %v797_v45 = vpack.c.bf16 %v779_v44, %v776_v40 }
 0x22f   : > { %1384 = vmatpush3.bf16.msra.mxu0 %v797_v45 }
 0x230   : > { %1385 = vmatprep.subr.bf16.mxu0 %v1617_v12 }
 0x233   : > { %1386 = vmatpush3.bf16.msra.mxu0 %v798_v43 }
 0x236   : > { %1388 = vmatmul.mubr.bf16.vlgmr.msra.gmra.mrb[20].mxu0 %v876_v47 }
 0x309   : > { %v926_v49 = vpop.f32.mrb[20].mxu0 }
 0x30a   : > { %v927_v50 = vadd.f32 %v1248_v48, %v926_v49  ;;  %v1389_v51 = vpop.f32.mrb[21].mxu0 }
 0x30b   : > { %v929_v52 = vpop.f32.mrb[22].mxu0 }
 0x30c   : > { %932 = vmax.xlane.f32.xlu0 %v927_v50  ;;  %v1390_v53 = vpop.f32.mrb[23].mxu0 }
 0x399   : > { %v933_v59 = vpop.xlane.xlu0 %932 }
 0x39a   : > { %v934_v60 = vsub.f32 %v927_v50, %v933_v59 }
 0x39c   : > { %v935_v61 = vmul.f32 1.442695, %v934_v60 }
 0x39e   : > { %1501 = vpow2.f32 %v935_v61 }
 0x3a8   : > { %v1502_v62 = vpop.eup %1501 }
 0x3a9   : > { %937 = vadd.xlane.f32.xlu0 %v1502_v62 }
 0x436   : > { %v938_v2 = vpop.xlane.xlu0 %937 }
 0x437   : > { %1503 = vrcp.f32 %v938_v2 }
 0x441   : > { %v1504_v3 = vpop.eup %1503 }
 0x442   : > { %v940_v4 = vmul.f32 %v1504_v3, %v1502_v62 }
 0x444   : > { %v941_v5 = vpack.c.bf16 %v940_v4, %v940_v4 }
 0x446   : > { %1408 = vmatmul.mubr.bf16.vlgmr.msra.gmra.mrb[16].mxu1 %v941_v5  ;;  %1047 = vst [vmem:[%s384_s24] sm:$0xf] %v941_v5 }
 0x447   : > { %1518 = shalt.err (!%p1515_p5)
}
 0x448   : > { %s1519_s23 = scalar_lea.hbm %s1843_s16, 64  ;;  %s1523_s28 = scalar_lea.hbm %s1926_s9, 128 }
 0x449   : > { %p1520_p6 = scmp.ne.s32.totalorder %s1843_s16, %s1519_s23  ;;  %p1524_p10 = scmp.lt.u32.totalorder %s1843_s16, %s1926_s9 }
 0x44a   : > { %p1525_p11 = scmp.lt.u32.totalorder %s1523_s28, %s1519_s23  ;;  %p1527_p13 = scmp.lt.u32.totalorder %s1519_s23, %s1843_s16 }
 0x44b   : > { %p1521_p7 = pnand %p1520_p6, %p1711_p4 }
 0x44c   : > { %p1526_p12 = por %p1525_p11, %p1524_p10 }
 0x44d   : > { %p1522_p9 = pneg %p1521_p7 }
 0x44e   : > { %p1528_p0 = por %p1527_p13, %p1526_p12 }
 0x450   : > { %p1529_p1 = pnand %p1528_p0, %p1522_p9 }
 0x452   : > { %1532 = shalt.err (!%p1529_p1)
}
 0x453   : > { %1412 = dma.vmem_to_hbm [thread:$0]  (%p1711_p4), %s1083_s26, 64, %s1843_s16, %s1054_s29  }
 0x454   : > { %s1212_s1 = sshll.u32 %s1836_s27, 3  ;;  %s1259_s15 = sshll.u32 %s1607_s12, 7 }
 0x455   : > { %s377_s20 = scalar_lea.vmem [#allocation3], %s1212_s1  ;;  %s1868_s28 = scalar_lea.hbm %s1925_s8, %s1259_s15 }
 0x456   : > { %s1068_s24 = sshll.u32 %s377_s20, 4  ;;  %s1049_s26 = scalar_lea.sflag [#allocation4], %s1836_s27  ;;  %s1870_s24 = int_to_ptr.vmem [resolvable:$true] %s1068_s24 }
 0x457   : > { %s1533_s16 = scalar_lea.vmem %s1870_s24, 128  ;;  %s1620_s12 = smov [#allocation3]  }
 0x458   : > { %p1534_p2 = scmp.ne.s32.totalorder %s1870_s24, %s1533_s16  ;;  %s1537_s29 = sshll.u32 %s1620_s12, 4  ;;  %s1538_s29 = int_to_ptr.vmem [resolvable:$false] %s1537_s29 }
 0x459   : > { %s1539_s23 = scalar_lea.vmem %s1538_s29, 256  ;;  %p1540_p6 = scmp.lt.s32.totalorder %s1870_s24, %s1538_s29 }
 0x45a   : > { %p1535_p3 = pnand %p1534_p2, %p1711_p4  ;;  %p1541_p7 = scmp.lt.s32.totalorder %s1539_s23, %s1533_s16 }
 0x45c   : > { %p1536_p5 = pneg %p1535_p3  ;;  %p1542_p9 = por %p1541_p7, %p1540_p6 }
 0x45e   : > { %p1543_p10 = pnand %p1542_p9, %p1536_p5 }
 0x519   : > { %v1040_v12 = vpop.f32.mrb[16].mxu1 }
 0x51a   : > { %1046 = vst.msk [vmem:[%s377_s20] sm:$0xff] %vm484_vm0, %v1040_v12  ;;  %v1409_v6 = vpop.f32.mrb[17].mxu1 }
 0x51b   : > { %v1043_v7 = vpop.f32.mrb[18].mxu1 }
 0x51c   : > { %1546 = shalt.err (!%p1543_p10)
}
 0x51d   : > { %s1547_s27 = scalar_lea.hbm %s1868_s28, 128  ;;  %s1551_s15 = scalar_lea.hbm %s1925_s8, 256 }
 0x51e   : > { %p1548_p11 = scmp.ne.s32.totalorder %s1868_s28, %s1547_s27  ;;  %p1552_p0 = scmp.lt.u32.totalorder %s1868_s28, %s1925_s8 }
 0x51f   : > { %p1553_p1 = scmp.lt.u32.totalorder %s1551_s15, %s1547_s27  ;;  %p1555_p3 = scmp.lt.u32.totalorder %s1547_s27, %s1868_s28 }
 0x520   : > { %p1549_p12 = pnand %p1548_p11, %p1711_p4 }
 0x521   : > { %p1554_p2 = por %p1553_p1, %p1552_p0 }
 0x522   : > { %p1550_p13 = pneg %p1549_p12 }
 0x523   : > { %p1556_p5 = por %p1555_p3, %p1554_p2 }
 0x525   : > { %p1557_p6 = pnand %p1556_p5, %p1550_p13 }
 0x527   : > { %1560 = shalt.err (!%p1557_p6)
}
 0x528   : > { %1411 = dma.vmem_to_hbm [thread:$0]  (%p1711_p4), %s1870_s24, 128, %s1868_s28, %s1049_s26   ;;  %v1410_v8 = vpop.f32.mrb[19].mxu1 }
 0x529 PF: > { %p1422_p7 = scmp.ge.s32.totalorder %s1615_s14, 2  ;;  %s1094_s0 = sand.u32 1, %s1595_s30  }
 0x52a   : > { %s1095_s16 = scalar_lea.sflag [#allocation4], %s1094_s0 }
 0x52b   : > { %p1416_p9 = pnand %p1422_p7, %p1718_p8 }
 0x52d   : > { %1586 = dma.done.wait (!%p1416_p9), %s1095_s16, 128  }
 0x52e   : > { %1588 = vsyncadd (!%p1416_p9), %s1095_s16, 4294967168  ;;  %s1104_s12 = scalar_lea.sflag [#allocation6], %s1094_s0 }
 0x52f   : > { %1590 = dma.done.wait (!%p1416_p9), %s1104_s12, 64  }
 0x530   : > { %1592 = vsyncadd (!%p1416_p9), %s1104_s12, 4294967232  ;;  %s26_s14 = sadd.s32 1, %s1615_s14   ;;  %s1933_s30 = smov %s1599_s10 }
 0x531   : > { %p23_p10 = scmp.ge.s32.totalorder %s26_s14, 4   ;;  %s1934_s10 = smov %s1603_s11 }
 0x532   : > { %s1935_s11 = smov %s1724_s22  ;;  %s1936_s12 = smov %s1611_s13 }
 0x533   : > { %s1937_s13 = smov %s1939_s17  ;;  %25 = sbr.rel (!%p23_p10) target bundleno = 9 (0x9), region = 114 }
 0x53a   :  { %1109 = vsyncpa [#allocation4], 1 }
 0x53b   :  { %1111 = vsyncpa [#allocation4 + $0x1], 1 }
 0x53c   :  { %1112 = vsyncpa [#allocation6], 1 }
 0x53d   :  { %1114 = vsyncpa [#allocation6 + $0x1], 1 }

</bundles_post_ra>
